<compile_context>
chip_gen: v6e
topology: v6e:2x2x1
jax: 0.10.0
libtpu: 0.0.40
codegen_flags: <defaults>
</compile_context>

<pallas_src>
import jax
import jax.numpy as jnp
from jax.experimental import pallas as pl
from jax.experimental.pallas import tpu as pltpu

# Exact f32 matmuls so kernel and reference agree tightly.  Only two small dots remain in the
# kernel, so the multi-pass cost is irrelevant here; at production sizes use bf16 inputs with
# f32 accumulation instead (perf-review item 9).
jax.config.update("jax_default_matmul_precision", "highest")

# ---------------- model sizes (consistent with the module) ----------------
B = 2          # batch
C_IN = 4       # inp_channels
C_OUT = 16     # out_channels (divisible by n_groups)
EMB = 32       # embed_dim
H = 16         # horizon
K = 5          # kernel_size
G = 8          # n_groups
CG = C_OUT // G          # channels per group (= 2)
P = K // 2               # conv padding
EPS = 1e-5
BH = B * H

# fused parameter slab layout (one DMA instead of ~14 sub-KB DMAs)
SLAB_R = 3 * C_OUT       # rows: [w1 | residual-1x1] on 0:32, [w2 | tw] on 32:48
SLAB_C = 128             # one full lane tile
VEC_OFF = 32             # lane offset of the packed per-channel vectors
N_VEC = 8                # b1, g1w, g1b, b2, g2w, g2b, tb, rb


# ---------------------------------- Pallas kernel --------------------------------
def _rtb_kernel(xcol_ref, t_ref, slab_ref, o_ref):
    def mish(v):
        sp = jnp.where(v > 20.0, v, jnp.log1p(jnp.exp(jnp.minimum(v, 20.0))))
        return v * jnp.tanh(sp)

    def lane_shift(a, d):
        # result[:, g] = a[:, (g + d) % BH]  (static d; wrapped lanes are masked by the caller)
        if d == 0:
            return a
        return jnp.concatenate([a[:, d:], a[:, :d]], axis=1)

    def group_totals(s):
        # Channels were permuted in the wrapper so group g occupies rows {g, g+G, ...}:
        # the group reduction/expansion are aligned sublane adds & concats — no MXU (item 6).
        gs = s[0:G, :]
        for m in range(1, CG):
            gs = gs + s[m * G:(m + 1) * G, :]
        return jnp.concatenate([gs] * CG, axis=0)

    def seg_reduce(a):
        # per-channel sums over each batch segment of the lane axis: [C_OUT, B*H] -> [C_OUT, B]
        return jnp.concatenate(
            [jnp.sum(a[:, b * H:(b + 1) * H], axis=-1, keepdims=True) for b in range(B)],
            axis=-1)

    def seg_expand(a):
        # [C_OUT, B] -> [C_OUT, B*H]  (broadcast each batch column over its horizon segment)
        return jnp.concatenate(
            [jnp.broadcast_to(a[:, b:b + 1], (C_OUT, H)) for b in range(B)], axis=-1)

    def groupnorm(h, gamma, beta):
        n = float(CG * H)
        mean = seg_expand(group_totals(seg_reduce(h)) / n)
        d = h - mean                                     # centered (two-pass) variance
        var = seg_expand(group_totals(seg_reduce(d * d)) / n)
        return d * jax.lax.rsqrt(var + EPS) * gamma + beta

    # ---- unpack the fused parameter slab (static sub-block reads, item 5) -------
    w_in = slab_ref[0:2 * C_OUT, 0:K * C_IN]                        # conv1 weights stacked on residual 1x1 weights
    w2 = slab_ref[2 * C_OUT:3 * C_OUT, 0:K * C_OUT]                 # conv2 im2col weights
    tw = slab_ref[2 * C_OUT:3 * C_OUT, K * C_OUT:K * C_OUT + EMB]   # time-MLP linear weights
    vec = slab_ref[0:C_OUT, VEC_OFF:VEC_OFF + N_VEC]                # packed per-channel vectors
    b1, g1w, g1b = vec[:, 0:1], vec[:, 1:2], vec[:, 2:3]
    b2, g2w, g2b = vec[:, 3:4], vec[:, 4:5], vec[:, 5:6]
    tb, rb = vec[:, 6:7], vec[:, 7:8]

    # ---- conv1 (im2col) and the residual 1x1 conv in ONE MXU dot (item 3) -------
    z = jnp.dot(w_in, xcol_ref[...], preferred_element_type=jnp.float32)   # [2*C_OUT, B*H]
    conv1 = z[0:C_OUT, :] + b1
    res = z[C_OUT:2 * C_OUT, :] + rb

    # ---- block 1: GroupNorm -> Mish, plus the time embedding --------------------
    h1 = mish(groupnorm(conv1, g1w, g1b))

    # time MLP (Mish -> Linear) on the VPU: broadcast-multiply + lane reduce (item 7)
    tm = mish(t_ref[...])                                            # [B, EMB]
    tcols = [jnp.sum(tw * tm[b:b + 1, :], axis=-1, keepdims=True) for b in range(B)]
    h1 = h1 + jnp.concatenate(
        [jnp.broadcast_to(c, (C_OUT, H)) for c in tcols], axis=-1) + tb

    # ---- conv2 as a single im2col dot; padded taps built in registers (items 2/3) ----
    pos = jax.lax.broadcasted_iota(jnp.int32, (C_OUT, BH), 1) % H
    taps = []
    for k in range(K):
        d = k - P
        sh = lane_shift(h1, d)
        if d != 0:
            # zero the lanes where the shift would cross a batch-segment / padding boundary
            sh = jnp.where((pos + d >= 0) & (pos + d < H), sh, 0.0)
        taps.append(sh)
    h1col = jnp.concatenate(taps, axis=0)                            # [K*C_OUT, B*H]
    conv2 = jnp.dot(w2, h1col, preferred_element_type=jnp.float32) + b2
    h2 = mish(groupnorm(conv2, g2w, g2b))

    o_ref[...] = (h2 + res).astype(o_ref.dtype)


# ------------------------------------ wrapper -------------------------------------
def residual_temporal_block(x, t, p):
    """x: [B, C_in, H] f32, t: [B, EMB] f32 -> [B, C_out, H] f32."""
    f32 = jnp.float32

    # Channel permutation so each GroupNorm group occupies rows {g, g+G, ...} inside the kernel:
    # the group reduction becomes an aligned [G,*] sublane add (no MXU micro-dots, no strided ops).
    old_of_new = jnp.array([(r % G) * CG + r // G for r in range(C_OUT)], jnp.int32)
    new_of_old = jnp.array([(c % CG) * G + c // CG for c in range(C_OUT)], jnp.int32)

    # ---- lane-dense im2col of the input (layout only; item 1/3): [K*C_in, B*H] ----
    x_pad = jnp.pad(x, ((0, 0), (0, 0), (P, P)))                          # [B, C_in, H+2P]
    xcol = jnp.stack([x_pad[:, :, k:k + H] for k in range(K)], axis=1)    # [B, K, C_in, H]
    xcol = xcol.reshape(B, K * C_IN, H).transpose(1, 0, 2).reshape(K * C_IN, BH)

    # ---- fused parameter slab: one DMA instead of ~14 (item 5) --------------------
    w1col = jnp.transpose(p["w1"], (0, 2, 1)).reshape(C_OUT, K * C_IN)[old_of_new]
    rwpad = jnp.zeros((C_OUT, K * C_IN), f32).at[:, P * C_IN:(P + 1) * C_IN].set(p["rw"])[old_of_new]
    w2p = p["w2"][old_of_new][:, old_of_new, :]                           # permute out & in channels
    w2col = jnp.transpose(w2p, (0, 2, 1)).reshape(C_OUT, K * C_OUT)
    twp = p["tw"][old_of_new]
    vecs = jnp.stack([p["b1"], p["g1w"], p["g1b"], p["b2"], p["g2w"], p["g2b"],
                      p["tb"], p["rb"]], axis=1)[old_of_new]              # [C_OUT, 8]

    slab = jnp.zeros((SLAB_R, SLAB_C), f32)
    slab = slab.at[0:C_OUT, 0:K * C_IN].set(w1col)
    slab = slab.at[C_OUT:2 * C_OUT, 0:K * C_IN].set(rwpad)
    slab = slab.at[0:C_OUT, VEC_OFF:VEC_OFF + N_VEC].set(vecs)
    slab = slab.at[2 * C_OUT:3 * C_OUT, 0:K * C_OUT].set(w2col)
    slab = slab.at[2 * C_OUT:3 * C_OUT, K * C_OUT:K * C_OUT + EMB].set(twp)

    out2d = pl.pallas_call(
        _rtb_kernel,
        out_shape=jax.ShapeDtypeStruct((C_OUT, BH), f32),
        grid_spec=pltpu.PrefetchScalarGridSpec(
            num_scalar_prefetch=0,
            grid=(1,),                                     # batch folded into lanes (item 1)
            in_specs=[
                pl.BlockSpec((K * C_IN, BH), lambda i: (0, 0)),
                pl.BlockSpec((B, EMB), lambda i: (0, 0)),
                pl.BlockSpec((SLAB_R, SLAB_C), lambda i: (0, 0)),
            ],
            out_specs=pl.BlockSpec((C_OUT, BH), lambda i: (0, 0)),   # lane-dense output (item 8)
        ),
        compiler_params=pltpu.CompilerParams(dimension_semantics=("arbitrary",)),
    )(xcol, t, slab)

    out2d = out2d[new_of_old]                              # undo the channel permutation
    return out2d.reshape(C_OUT, B, H).transpose(1, 0, 2)   # back to [B, C_out, H]


# ------------------------------- pure-JAX reference -------------------------------
def _ref_forward(x, t, p):
    def conv1d(xx, w, b, pad):
        y = jax.lax.conv_general_dilated(
            xx, w, window_strides=(1,), padding=[(pad, pad)],
            dimension_numbers=("NCH", "OIH", "NCH"))
        return y + b[None, :, None]

    def groupnorm(h, gamma, beta):
        b_, c_, h_ = h.shape
        hg = h.reshape(b_, G, (c_ // G) * h_)
        mu = hg.mean(-1, keepdims=True)
        var = hg.var(-1, keepdims=True)
        hn = ((hg - mu) / jnp.sqrt(var + EPS)).reshape(b_, c_, h_)
        return hn * gamma[None, :, None] + beta[None, :, None]

    def mish(v):
        return v * jnp.tanh(jax.nn.softplus(v))

    h = mish(groupnorm(conv1d(x, p["w1"], p["b1"], P), p["g1w"], p["g1b"]))
    tm = mish(t) @ p["tw"].T + p["tb"]                     # [B, C_out]
    h = h + tm[:, :, None]
    h2 = mish(groupnorm(conv1d(h, p["w2"], p["b2"], P), p["g2w"], p["g2b"]))
    res = conv1d(x, p["rw"][:, :, None], p["rb"], 0)
    return h2 + res


# ------------------------------------- main ---------------------------------------
if __name__ == "__main__":
    key = jax.random.PRNGKey(0)
    ks = jax.random.split(key, 14)

    params = {
        "w1": jax.random.normal(ks[0], (C_OUT, C_IN, K), jnp.float32) * 0.2,
        "b1": jax.random.normal(ks[1], (C_OUT,), jnp.float32) * 0.1,
        "g1w": 1.0 + 0.1 * jax.random.normal(ks[2], (C_OUT,), jnp.float32),
        "g1b": 0.1 * jax.random.normal(ks[3], (C_OUT,), jnp.float32),
        "w2": jax.random.normal(ks[4], (C_OUT, C_OUT, K), jnp.float32) * 0.1,
        "b2": jax.random.normal(ks[5], (C_OUT,), jnp.float32) * 0.1,
        "g2w": 1.0 + 0.1 * jax.random.normal(ks[6], (C_OUT,), jnp.float32),
        "g2b": 0.1 * jax.random.normal(ks[7], (C_OUT,), jnp.float32),
        "tw": jax.random.normal(ks[8], (C_OUT, EMB), jnp.float32) * 0.1,   # Linear(EMB -> C_OUT)
        "tb": jax.random.normal(ks[9], (C_OUT,), jnp.float32) * 0.1,
        "rw": jax.random.normal(ks[10], (C_OUT, C_IN), jnp.float32) * 0.3,  # 1x1 residual conv
        "rb": jax.random.normal(ks[11], (C_OUT,), jnp.float32) * 0.1,
    }

    x = jax.random.normal(ks[12], (B, C_IN, H), jnp.float32)
    t = jax.random.normal(ks[13], (B, EMB), jnp.float32)

    out = jax.block_until_ready(residual_temporal_block(x, t, params))
    ref = jax.block_until_ready(_ref_forward(x, t, params))

    assert out.shape == (B, C_OUT, H), out.shape
    max_err = float(jnp.max(jnp.abs(out - ref)))
    assert jnp.allclose(out, ref, atol=1e-4, rtol=1e-4), f"max abs err = {max_err}"
    print("KERNEL_OK")
</pallas_src>

<mosaic_0001>
module attributes {stable_mosaic.version = 11 : i64} {
  func.func @_rtb_kernel(%arg0: i32, %arg1: memref<20x32xf32, #tpu.memory_space<vmem>>, %arg2: memref<2x32xf32, #tpu.memory_space<vmem>>, %arg3: memref<48x128xf32, #tpu.memory_space<vmem>>, %arg4: memref<16x32xf32, #tpu.memory_space<vmem>>) attributes {dimension_semantics = [#tpu.dimension_semantics<arbitrary>], iteration_bounds = array<i64: 1>, scalar_prefetch = 0 : i64, scratch_operands = 0 : i64, tpu.core_type = #tpu.core_type<tc>, window_params = [{pipeline_mode = #tpu.pipeline_mode<synchronous>, transform_indices = @transform_0, window_bounds = array<i64: 20, 32>}, {pipeline_mode = #tpu.pipeline_mode<synchronous>, transform_indices = @transform_1, window_bounds = array<i64: 2, 32>}, {pipeline_mode = #tpu.pipeline_mode<synchronous>, transform_indices = @transform_2, window_bounds = array<i64: 48, 128>}, {pipeline_mode = #tpu.pipeline_mode<synchronous>, transform_indices = @transform_3, window_bounds = array<i64: 16, 32>}]} {
    %c0 = arith.constant 0 : index
    %c0_0 = arith.constant 0 : index
    %0 = vector.load %arg3[%c0, %c0_0] : memref<48x128xf32, #tpu.memory_space<vmem>>, vector<32x20xf32>
    %c32 = arith.constant 32 : index
    %c0_1 = arith.constant 0 : index
    %1 = vector.load %arg3[%c32, %c0_1] : memref<48x128xf32, #tpu.memory_space<vmem>>, vector<16x80xf32>
    %c32_2 = arith.constant 32 : index
    %c80 = arith.constant 80 : index
    %2 = vector.load %arg3[%c32_2, %c80] : memref<48x128xf32, #tpu.memory_space<vmem>>, vector<16x32xf32>
    %c0_3 = arith.constant 0 : index
    %c32_4 = arith.constant 32 : index
    %3 = vector.load %arg3[%c0_3, %c32_4] : memref<48x128xf32, #tpu.memory_space<vmem>>, vector<16x8xf32>
    %4 = vector.extract_strided_slice %3 {offsets = [0, 0], sizes = [16, 1], strides = [1, 1]} : vector<16x8xf32> to vector<16x1xf32>
    %5 = vector.extract_strided_slice %3 {offsets = [0, 1], sizes = [16, 1], strides = [1, 1]} : vector<16x8xf32> to vector<16x1xf32>
    %6 = vector.extract_strided_slice %3 {offsets = [0, 2], sizes = [16, 1], strides = [1, 1]} : vector<16x8xf32> to vector<16x1xf32>
    %7 = vector.extract_strided_slice %3 {offsets = [0, 3], sizes = [16, 1], strides = [1, 1]} : vector<16x8xf32> to vector<16x1xf32>
    %8 = vector.extract_strided_slice %3 {offsets = [0, 4], sizes = [16, 1], strides = [1, 1]} : vector<16x8xf32> to vector<16x1xf32>
    %9 = vector.extract_strided_slice %3 {offsets = [0, 5], sizes = [16, 1], strides = [1, 1]} : vector<16x8xf32> to vector<16x1xf32>
    %10 = vector.extract_strided_slice %3 {offsets = [0, 6], sizes = [16, 1], strides = [1, 1]} : vector<16x8xf32> to vector<16x1xf32>
    %11 = vector.extract_strided_slice %3 {offsets = [0, 7], sizes = [16, 1], strides = [1, 1]} : vector<16x8xf32> to vector<16x1xf32>
    %c0_5 = arith.constant 0 : index
    %c0_6 = arith.constant 0 : index
    %12 = vector.load %arg1[%c0_5, %c0_6] : memref<20x32xf32, #tpu.memory_space<vmem>>, vector<20x32xf32>
    %cst = arith.constant dense<0.000000e+00> : vector<32x32xf32>
    %13 = tpu.matmul %0, %12, %cst {dimension_numbers = #tpu.dot_dimension_numbers<[1], [0], [0], [1], [0, 0, 1, 1], [], []>, precision = #tpu.contract_precision<fp32>} : vector<32x20xf32>, vector<20x32xf32>, vector<32x32xf32> -> vector<32x32xf32>
    %14 = vector.extract_strided_slice %13 {offsets = [0, 0], sizes = [16, 32], strides = [1, 1]} : vector<32x32xf32> to vector<16x32xf32>
    %15 = vector.broadcast %4 : vector<16x1xf32> to vector<16x32xf32>
    %16 = arith.addf %14, %15 : vector<16x32xf32>
    %17 = vector.extract_strided_slice %13 {offsets = [16, 0], sizes = [16, 32], strides = [1, 1]} : vector<32x32xf32> to vector<16x32xf32>
    %18 = vector.broadcast %11 : vector<16x1xf32> to vector<16x32xf32>
    %19 = arith.addf %17, %18 : vector<16x32xf32>
    %20 = vector.extract_strided_slice %16 {offsets = [0, 0], sizes = [16, 16], strides = [1, 1]} : vector<16x32xf32> to vector<16x16xf32>
    %cst_7 = arith.constant dense<0.000000e+00> : vector<16xf32>
    %21 = vector.multi_reduction <add>, %20, %cst_7 [1] : vector<16x16xf32> to vector<16xf32>
    %22 = vector.shape_cast %21 : vector<16xf32> to vector<16x1xf32>
    %23 = vector.extract_strided_slice %16 {offsets = [0, 16], sizes = [16, 16], strides = [1, 1]} : vector<16x32xf32> to vector<16x16xf32>
    %cst_8 = arith.constant dense<0.000000e+00> : vector<16xf32>
    %24 = vector.multi_reduction <add>, %23, %cst_8 [1] : vector<16x16xf32> to vector<16xf32>
    %25 = vector.shape_cast %24 : vector<16xf32> to vector<16x1xf32>
    %26 = tpu.concatenate %22, %25 in 1 : vector<16x1xf32>, vector<16x1xf32> -> vector<16x2xf32>
    %27 = vector.extract_strided_slice %26 {offsets = [0, 0], sizes = [8, 2], strides = [1, 1]} : vector<16x2xf32> to vector<8x2xf32>
    %28 = vector.extract_strided_slice %26 {offsets = [8, 0], sizes = [8, 2], strides = [1, 1]} : vector<16x2xf32> to vector<8x2xf32>
    %29 = arith.addf %27, %28 : vector<8x2xf32>
    %30 = tpu.concatenate %29, %29 in 0 : vector<8x2xf32>, vector<8x2xf32> -> vector<16x2xf32>
    %cst_9 = arith.constant 3.200000e+01 : f32
    %31 = vector.broadcast %cst_9 : f32 to vector<16x2xf32>
    %32 = arith.divf %30, %31 : vector<16x2xf32>
    %33 = vector.extract_strided_slice %32 {offsets = [0, 0], sizes = [16, 1], strides = [1, 1]} : vector<16x2xf32> to vector<16x1xf32>
    %34 = vector.shape_cast %33 : vector<16x1xf32> to vector<16x1xf32>
    %35 = vector.broadcast %34 : vector<16x1xf32> to vector<16x16xf32>
    %36 = vector.extract_strided_slice %32 {offsets = [0, 1], sizes = [16, 1], strides = [1, 1]} : vector<16x2xf32> to vector<16x1xf32>
    %37 = vector.shape_cast %36 : vector<16x1xf32> to vector<16x1xf32>
    %38 = vector.broadcast %37 : vector<16x1xf32> to vector<16x16xf32>
    %39 = tpu.concatenate %35, %38 in 1 : vector<16x16xf32>, vector<16x16xf32> -> vector<16x32xf32>
    %40 = arith.subf %16, %39 : vector<16x32xf32>
    %41 = arith.mulf %40, %40 : vector<16x32xf32>
    %42 = vector.extract_strided_slice %41 {offsets = [0, 0], sizes = [16, 16], strides = [1, 1]} : vector<16x32xf32> to vector<16x16xf32>
    %cst_10 = arith.constant dense<0.000000e+00> : vector<16xf32>
    %43 = vector.multi_reduction <add>, %42, %cst_10 [1] : vector<16x16xf32> to vector<16xf32>
    %44 = vector.shape_cast %43 : vector<16xf32> to vector<16x1xf32>
    %45 = vector.extract_strided_slice %41 {offsets = [0, 16], sizes = [16, 16], strides = [1, 1]} : vector<16x32xf32> to vector<16x16xf32>
    %cst_11 = arith.constant dense<0.000000e+00> : vector<16xf32>
    %46 = vector.multi_reduction <add>, %45, %cst_11 [1] : vector<16x16xf32> to vector<16xf32>
    %47 = vector.shape_cast %46 : vector<16xf32> to vector<16x1xf32>
    %48 = tpu.concatenate %44, %47 in 1 : vector<16x1xf32>, vector<16x1xf32> -> vector<16x2xf32>
    %49 = vector.extract_strided_slice %48 {offsets = [0, 0], sizes = [8, 2], strides = [1, 1]} : vector<16x2xf32> to vector<8x2xf32>
    %50 = vector.extract_strided_slice %48 {offsets = [8, 0], sizes = [8, 2], strides = [1, 1]} : vector<16x2xf32> to vector<8x2xf32>
    %51 = arith.addf %49, %50 : vector<8x2xf32>
    %52 = tpu.concatenate %51, %51 in 0 : vector<8x2xf32>, vector<8x2xf32> -> vector<16x2xf32>
    %cst_12 = arith.constant 3.200000e+01 : f32
    %53 = vector.broadcast %cst_12 : f32 to vector<16x2xf32>
    %54 = arith.divf %52, %53 : vector<16x2xf32>
    %55 = vector.extract_strided_slice %54 {offsets = [0, 0], sizes = [16, 1], strides = [1, 1]} : vector<16x2xf32> to vector<16x1xf32>
    %56 = vector.shape_cast %55 : vector<16x1xf32> to vector<16x1xf32>
    %57 = vector.broadcast %56 : vector<16x1xf32> to vector<16x16xf32>
    %58 = vector.extract_strided_slice %54 {offsets = [0, 1], sizes = [16, 1], strides = [1, 1]} : vector<16x2xf32> to vector<16x1xf32>
    %59 = vector.shape_cast %58 : vector<16x1xf32> to vector<16x1xf32>
    %60 = vector.broadcast %59 : vector<16x1xf32> to vector<16x16xf32>
    %61 = tpu.concatenate %57, %60 in 1 : vector<16x16xf32>, vector<16x16xf32> -> vector<16x32xf32>
    %cst_13 = arith.constant 9.99999974E-6 : f32
    %62 = vector.broadcast %cst_13 : f32 to vector<16x32xf32>
    %63 = arith.addf %61, %62 : vector<16x32xf32>
    %64 = math.rsqrt %63 : vector<16x32xf32>
    %65 = arith.mulf %40, %64 : vector<16x32xf32>
    %66 = vector.broadcast %5 : vector<16x1xf32> to vector<16x32xf32>
    %67 = arith.mulf %65, %66 : vector<16x32xf32>
    %68 = vector.broadcast %6 : vector<16x1xf32> to vector<16x32xf32>
    %69 = arith.addf %67, %68 : vector<16x32xf32>
    %cst_14 = arith.constant 2.000000e+01 : f32
    %70 = vector.broadcast %cst_14 : f32 to vector<16x32xf32>
    %71 = arith.cmpf ogt, %69, %70 : vector<16x32xf32>
    %cst_15 = arith.constant 2.000000e+01 : f32
    %72 = vector.broadcast %cst_15 : f32 to vector<16x32xf32>
    %73 = arith.minimumf %69, %72 : vector<16x32xf32>
    %74 = math.exp %73 : vector<16x32xf32>
    %75 = math.log1p %74 : vector<16x32xf32>
    %76 = arith.select %71, %69, %75 : vector<16x32xi1>, vector<16x32xf32>
    %77 = math.tanh %76 : vector<16x32xf32>
    %78 = arith.mulf %69, %77 : vector<16x32xf32>
    %c0_16 = arith.constant 0 : index
    %c0_17 = arith.constant 0 : index
    %79 = vector.load %arg2[%c0_16, %c0_17] : memref<2x32xf32, #tpu.memory_space<vmem>>, vector<2x32xf32>
    %cst_18 = arith.constant 2.000000e+01 : f32
    %80 = vector.broadcast %cst_18 : f32 to vector<2x32xf32>
    %81 = arith.cmpf ogt, %79, %80 : vector<2x32xf32>
    %cst_19 = arith.constant 2.000000e+01 : f32
    %82 = vector.broadcast %cst_19 : f32 to vector<2x32xf32>
    %83 = arith.minimumf %79, %82 : vector<2x32xf32>
    %84 = math.exp %83 : vector<2x32xf32>
    %85 = math.log1p %84 : vector<2x32xf32>
    %86 = arith.select %81, %79, %85 : vector<2x32xi1>, vector<2x32xf32>
    %87 = math.tanh %86 : vector<2x32xf32>
    %88 = arith.mulf %79, %87 : vector<2x32xf32>
    %89 = vector.extract_strided_slice %88 {offsets = [0, 0], sizes = [1, 32], strides = [1, 1]} : vector<2x32xf32> to vector<1x32xf32>
    %90 = vector.broadcast %89 : vector<1x32xf32> to vector<16x32xf32>
    %91 = arith.mulf %2, %90 : vector<16x32xf32>
    %cst_20 = arith.constant dense<0.000000e+00> : vector<16xf32>
    %92 = vector.multi_reduction <add>, %91, %cst_20 [1] : vector<16x32xf32> to vector<16xf32>
    %93 = vector.shape_cast %92 : vector<16xf32> to vector<16x1xf32>
    %94 = vector.extract_strided_slice %88 {offsets = [1, 0], sizes = [1, 32], strides = [1, 1]} : vector<2x32xf32> to vector<1x32xf32>
    %95 = vector.broadcast %94 : vector<1x32xf32> to vector<16x32xf32>
    %96 = arith.mulf %2, %95 : vector<16x32xf32>
    %cst_21 = arith.constant dense<0.000000e+00> : vector<16xf32>
    %97 = vector.multi_reduction <add>, %96, %cst_21 [1] : vector<16x32xf32> to vector<16xf32>
    %98 = vector.shape_cast %97 : vector<16xf32> to vector<16x1xf32>
    %99 = vector.shape_cast %93 : vector<16x1xf32> to vector<16x1xf32>
    %100 = vector.broadcast %99 : vector<16x1xf32> to vector<16x16xf32>
    %101 = vector.shape_cast %98 : vector<16x1xf32> to vector<16x1xf32>
    %102 = vector.broadcast %101 : vector<16x1xf32> to vector<16x16xf32>
    %103 = tpu.concatenate %100, %102 in 1 : vector<16x16xf32>, vector<16x16xf32> -> vector<16x32xf32>
    %104 = arith.addf %78, %103 : vector<16x32xf32>
    %105 = vector.broadcast %10 : vector<16x1xf32> to vector<16x32xf32>
    %106 = arith.addf %104, %105 : vector<16x32xf32>
    %107 = tpu.iota {dimensions = array<i32: 1>} : vector<16x32xi32>
    %c16_i32 = arith.constant 16 : i32
    %c0_i32 = arith.constant 0 : i32
    %108 = arith.cmpi eq, %c16_i32, %c0_i32 : i32
    %c1_i32 = arith.constant 1 : i32
    %109 = arith.select %108, %c1_i32, %c16_i32 : i32
    %110 = vector.broadcast %109 : i32 to vector<16x32xi32>
    %111 = arith.remsi %107, %110 : vector<16x32xi32>
    %c0_i32_22 = arith.constant 0 : i32
    %112 = vector.broadcast %c0_i32_22 : i32 to vector<16x32xi32>
    %113 = arith.cmpi ne, %111, %112 : vector<16x32xi32>
    %c0_i32_23 = arith.constant 0 : i32
    %114 = vector.broadcast %c0_i32_23 : i32 to vector<16x32xi32>
    %115 = arith.cmpi slt, %111, %114 : vector<16x32xi32>
    %c0_i32_24 = arith.constant 0 : i32
    %116 = arith.cmpi slt, %109, %c0_i32_24 : i32
    %117 = vector.broadcast %116 : i1 to vector<16x32xi1>
    %118 = vector.broadcast %117 : vector<16x32xi1> to vector<16x32xi1>
    %119 = arith.xori %115, %118 : vector<16x32xi1>
    %120 = arith.andi %119, %113 : vector<16x32xi1>
    %121 = vector.broadcast %109 : i32 to vector<16x32xi32>
    %122 = arith.addi %111, %121 : vector<16x32xi32>
    %123 = arith.select %120, %122, %111 : vector<16x32xi1>, vector<16x32xi32>
    %124 = vector.extract_strided_slice %106 {offsets = [0, 30], sizes = [16, 2], strides = [1, 1]} : vector<16x32xf32> to vector<16x2xf32>
    %125 = vector.extract_strided_slice %106 {offsets = [0, 0], sizes = [16, 30], strides = [1, 1]} : vector<16x32xf32> to vector<16x30xf32>
    %126 = tpu.concatenate %124, %125 in 1 : vector<16x2xf32>, vector<16x30xf32> -> vector<16x32xf32>
    %c-2_i32 = arith.constant -2 : i32
    %127 = vector.broadcast %c-2_i32 : i32 to vector<16x32xi32>
    %128 = arith.addi %123, %127 : vector<16x32xi32>
    %c0_i32_25 = arith.constant 0 : i32
    %129 = vector.broadcast %c0_i32_25 : i32 to vector<16x32xi32>
    %130 = arith.cmpi sge, %128, %129 : vector<16x32xi32>
    %c-2_i32_26 = arith.constant -2 : i32
    %131 = vector.broadcast %c-2_i32_26 : i32 to vector<16x32xi32>
    %132 = arith.addi %123, %131 : vector<16x32xi32>
    %c16_i32_27 = arith.constant 16 : i32
    %133 = vector.broadcast %c16_i32_27 : i32 to vector<16x32xi32>
    %134 = arith.cmpi slt, %132, %133 : vector<16x32xi32>
    %135 = arith.andi %130, %134 : vector<16x32xi1>
    %cst_28 = arith.constant 0.000000e+00 : f32
    %136 = vector.broadcast %cst_28 : f32 to vector<16x32xf32>
    %137 = arith.select %135, %126, %136 : vector<16x32xi1>, vector<16x32xf32>
    %138 = vector.extract_strided_slice %106 {offsets = [0, 31], sizes = [16, 1], strides = [1, 1]} : vector<16x32xf32> to vector<16x1xf32>
    %139 = vector.extract_strided_slice %106 {offsets = [0, 0], sizes = [16, 31], strides = [1, 1]} : vector<16x32xf32> to vector<16x31xf32>
    %140 = tpu.concatenate %138, %139 in 1 : vector<16x1xf32>, vector<16x31xf32> -> vector<16x32xf32>
    %c-1_i32 = arith.constant -1 : i32
    %141 = vector.broadcast %c-1_i32 : i32 to vector<16x32xi32>
    %142 = arith.addi %123, %141 : vector<16x32xi32>
    %c0_i32_29 = arith.constant 0 : i32
    %143 = vector.broadcast %c0_i32_29 : i32 to vector<16x32xi32>
    %144 = arith.cmpi sge, %142, %143 : vector<16x32xi32>
    %c-1_i32_30 = arith.constant -1 : i32
    %145 = vector.broadcast %c-1_i32_30 : i32 to vector<16x32xi32>
    %146 = arith.addi %123, %145 : vector<16x32xi32>
    %c16_i32_31 = arith.constant 16 : i32
    %147 = vector.broadcast %c16_i32_31 : i32 to vector<16x32xi32>
    %148 = arith.cmpi slt, %146, %147 : vector<16x32xi32>
    %149 = arith.andi %144, %148 : vector<16x32xi1>
    %cst_32 = arith.constant 0.000000e+00 : f32
    %150 = vector.broadcast %cst_32 : f32 to vector<16x32xf32>
    %151 = arith.select %149, %140, %150 : vector<16x32xi1>, vector<16x32xf32>
    %152 = vector.extract_strided_slice %106 {offsets = [0, 1], sizes = [16, 31], strides = [1, 1]} : vector<16x32xf32> to vector<16x31xf32>
    %153 = vector.extract_strided_slice %106 {offsets = [0, 0], sizes = [16, 1], strides = [1, 1]} : vector<16x32xf32> to vector<16x1xf32>
    %154 = tpu.concatenate %152, %153 in 1 : vector<16x31xf32>, vector<16x1xf32> -> vector<16x32xf32>
    %c1_i32_33 = arith.constant 1 : i32
    %155 = vector.broadcast %c1_i32_33 : i32 to vector<16x32xi32>
    %156 = arith.addi %123, %155 : vector<16x32xi32>
    %c0_i32_34 = arith.constant 0 : i32
    %157 = vector.broadcast %c0_i32_34 : i32 to vector<16x32xi32>
    %158 = arith.cmpi sge, %156, %157 : vector<16x32xi32>
    %c1_i32_35 = arith.constant 1 : i32
    %159 = vector.broadcast %c1_i32_35 : i32 to vector<16x32xi32>
    %160 = arith.addi %123, %159 : vector<16x32xi32>
    %c16_i32_36 = arith.constant 16 : i32
    %161 = vector.broadcast %c16_i32_36 : i32 to vector<16x32xi32>
    %162 = arith.cmpi slt, %160, %161 : vector<16x32xi32>
    %163 = arith.andi %158, %162 : vector<16x32xi1>
    %cst_37 = arith.constant 0.000000e+00 : f32
    %164 = vector.broadcast %cst_37 : f32 to vector<16x32xf32>
    %165 = arith.select %163, %154, %164 : vector<16x32xi1>, vector<16x32xf32>
    %166 = vector.extract_strided_slice %106 {offsets = [0, 2], sizes = [16, 30], strides = [1, 1]} : vector<16x32xf32> to vector<16x30xf32>
    %167 = vector.extract_strided_slice %106 {offsets = [0, 0], sizes = [16, 2], strides = [1, 1]} : vector<16x32xf32> to vector<16x2xf32>
    %168 = tpu.concatenate %166, %167 in 1 : vector<16x30xf32>, vector<16x2xf32> -> vector<16x32xf32>
    %c2_i32 = arith.constant 2 : i32
    %169 = vector.broadcast %c2_i32 : i32 to vector<16x32xi32>
    %170 = arith.addi %123, %169 : vector<16x32xi32>
    %c0_i32_38 = arith.constant 0 : i32
    %171 = vector.broadcast %c0_i32_38 : i32 to vector<16x32xi32>
    %172 = arith.cmpi sge, %170, %171 : vector<16x32xi32>
    %c2_i32_39 = arith.constant 2 : i32
    %173 = vector.broadcast %c2_i32_39 : i32 to vector<16x32xi32>
    %174 = arith.addi %123, %173 : vector<16x32xi32>
    %c16_i32_40 = arith.constant 16 : i32
    %175 = vector.broadcast %c16_i32_40 : i32 to vector<16x32xi32>
    %176 = arith.cmpi slt, %174, %175 : vector<16x32xi32>
    %177 = arith.andi %172, %176 : vector<16x32xi1>
    %cst_41 = arith.constant 0.000000e+00 : f32
    %178 = vector.broadcast %cst_41 : f32 to vector<16x32xf32>
    %179 = arith.select %177, %168, %178 : vector<16x32xi1>, vector<16x32xf32>
    %180 = tpu.concatenate %137, %151, %106, %165, %179 in 0 : vector<16x32xf32>, vector<16x32xf32>, vector<16x32xf32>, vector<16x32xf32>, vector<16x32xf32> -> vector<80x32xf32>
    %cst_42 = arith.constant dense<0.000000e+00> : vector<16x32xf32>
    %181 = tpu.matmul %1, %180, %cst_42 {dimension_numbers = #tpu.dot_dimension_numbers<[1], [0], [0], [1], [0, 0, 1, 1], [], []>, precision = #tpu.contract_precision<fp32>} : vector<16x80xf32>, vector<80x32xf32>, vector<16x32xf32> -> vector<16x32xf32>
    %182 = vector.broadcast %7 : vector<16x1xf32> to vector<16x32xf32>
    %183 = arith.addf %181, %182 : vector<16x32xf32>
    %184 = vector.extract_strided_slice %183 {offsets = [0, 0], sizes = [16, 16], strides = [1, 1]} : vector<16x32xf32> to vector<16x16xf32>
    %cst_43 = arith.constant dense<0.000000e+00> : vector<16xf32>
    %185 = vector.multi_reduction <add>, %184, %cst_43 [1] : vector<16x16xf32> to vector<16xf32>
    %186 = vector.shape_cast %185 : vector<16xf32> to vector<16x1xf32>
    %187 = vector.extract_strided_slice %183 {offsets = [0, 16], sizes = [16, 16], strides = [1, 1]} : vector<16x32xf32> to vector<16x16xf32>
    %cst_44 = arith.constant dense<0.000000e+00> : vector<16xf32>
    %188 = vector.multi_reduction <add>, %187, %cst_44 [1] : vector<16x16xf32> to vector<16xf32>
    %189 = vector.shape_cast %188 : vector<16xf32> to vector<16x1xf32>
    %190 = tpu.concatenate %186, %189 in 1 : vector<16x1xf32>, vector<16x1xf32> -> vector<16x2xf32>
    %191 = vector.extract_strided_slice %190 {offsets = [0, 0], sizes = [8, 2], strides = [1, 1]} : vector<16x2xf32> to vector<8x2xf32>
    %192 = vector.extract_strided_slice %190 {offsets = [8, 0], sizes = [8, 2], strides = [1, 1]} : vector<16x2xf32> to vector<8x2xf32>
    %193 = arith.addf %191, %192 : vector<8x2xf32>
    %194 = tpu.concatenate %193, %193 in 0 : vector<8x2xf32>, vector<8x2xf32> -> vector<16x2xf32>
    %cst_45 = arith.constant 3.200000e+01 : f32
    %195 = vector.broadcast %cst_45 : f32 to vector<16x2xf32>
    %196 = arith.divf %194, %195 : vector<16x2xf32>
    %197 = vector.extract_strided_slice %196 {offsets = [0, 0], sizes = [16, 1], strides = [1, 1]} : vector<16x2xf32> to vector<16x1xf32>
    %198 = vector.shape_cast %197 : vector<16x1xf32> to vector<16x1xf32>
    %199 = vector.broadcast %198 : vector<16x1xf32> to vector<16x16xf32>
    %200 = vector.extract_strided_slice %196 {offsets = [0, 1], sizes = [16, 1], strides = [1, 1]} : vector<16x2xf32> to vector<16x1xf32>
    %201 = vector.shape_cast %200 : vector<16x1xf32> to vector<16x1xf32>
    %202 = vector.broadcast %201 : vector<16x1xf32> to vector<16x16xf32>
    %203 = tpu.concatenate %199, %202 in 1 : vector<16x16xf32>, vector<16x16xf32> -> vector<16x32xf32>
    %204 = arith.subf %183, %203 : vector<16x32xf32>
    %205 = arith.mulf %204, %204 : vector<16x32xf32>
    %206 = vector.extract_strided_slice %205 {offsets = [0, 0], sizes = [16, 16], strides = [1, 1]} : vector<16x32xf32> to vector<16x16xf32>
    %cst_46 = arith.constant dense<0.000000e+00> : vector<16xf32>
    %207 = vector.multi_reduction <add>, %206, %cst_46 [1] : vector<16x16xf32> to vector<16xf32>
    %208 = vector.shape_cast %207 : vector<16xf32> to vector<16x1xf32>
    %209 = vector.extract_strided_slice %205 {offsets = [0, 16], sizes = [16, 16], strides = [1, 1]} : vector<16x32xf32> to vector<16x16xf32>
    %cst_47 = arith.constant dense<0.000000e+00> : vector<16xf32>
    %210 = vector.multi_reduction <add>, %209, %cst_47 [1] : vector<16x16xf32> to vector<16xf32>
    %211 = vector.shape_cast %210 : vector<16xf32> to vector<16x1xf32>
    %212 = tpu.concatenate %208, %211 in 1 : vector<16x1xf32>, vector<16x1xf32> -> vector<16x2xf32>
    %213 = vector.extract_strided_slice %212 {offsets = [0, 0], sizes = [8, 2], strides = [1, 1]} : vector<16x2xf32> to vector<8x2xf32>
    %214 = vector.extract_strided_slice %212 {offsets = [8, 0], sizes = [8, 2], strides = [1, 1]} : vector<16x2xf32> to vector<8x2xf32>
    %215 = arith.addf %213, %214 : vector<8x2xf32>
    %216 = tpu.concatenate %215, %215 in 0 : vector<8x2xf32>, vector<8x2xf32> -> vector<16x2xf32>
    %cst_48 = arith.constant 3.200000e+01 : f32
    %217 = vector.broadcast %cst_48 : f32 to vector<16x2xf32>
    %218 = arith.divf %216, %217 : vector<16x2xf32>
    %219 = vector.extract_strided_slice %218 {offsets = [0, 0], sizes = [16, 1], strides = [1, 1]} : vector<16x2xf32> to vector<16x1xf32>
    %220 = vector.shape_cast %219 : vector<16x1xf32> to vector<16x1xf32>
    %221 = vector.broadcast %220 : vector<16x1xf32> to vector<16x16xf32>
    %222 = vector.extract_strided_slice %218 {offsets = [0, 1], sizes = [16, 1], strides = [1, 1]} : vector<16x2xf32> to vector<16x1xf32>
    %223 = vector.shape_cast %222 : vector<16x1xf32> to vector<16x1xf32>
    %224 = vector.broadcast %223 : vector<16x1xf32> to vector<16x16xf32>
    %225 = tpu.concatenate %221, %224 in 1 : vector<16x16xf32>, vector<16x16xf32> -> vector<16x32xf32>
    %cst_49 = arith.constant 9.99999974E-6 : f32
    %226 = vector.broadcast %cst_49 : f32 to vector<16x32xf32>
    %227 = arith.addf %225, %226 : vector<16x32xf32>
    %228 = math.rsqrt %227 : vector<16x32xf32>
    %229 = arith.mulf %204, %228 : vector<16x32xf32>
    %230 = vector.broadcast %8 : vector<16x1xf32> to vector<16x32xf32>
    %231 = arith.mulf %229, %230 : vector<16x32xf32>
    %232 = vector.broadcast %9 : vector<16x1xf32> to vector<16x32xf32>
    %233 = arith.addf %231, %232 : vector<16x32xf32>
    %cst_50 = arith.constant 2.000000e+01 : f32
    %234 = vector.broadcast %cst_50 : f32 to vector<16x32xf32>
    %235 = arith.cmpf ogt, %233, %234 : vector<16x32xf32>
    %cst_51 = arith.constant 2.000000e+01 : f32
    %236 = vector.broadcast %cst_51 : f32 to vector<16x32xf32>
    %237 = arith.minimumf %233, %236 : vector<16x32xf32>
    %238 = math.exp %237 : vector<16x32xf32>
    %239 = math.log1p %238 : vector<16x32xf32>
    %240 = arith.select %235, %233, %239 : vector<16x32xi1>, vector<16x32xf32>
    %241 = math.tanh %240 : vector<16x32xf32>
    %242 = arith.mulf %233, %241 : vector<16x32xf32>
    %243 = arith.addf %242, %19 : vector<16x32xf32>
    %c0_52 = arith.constant 0 : index
    %c0_53 = arith.constant 0 : index
    %244 = vector.load %arg4[%c0_52, %c0_53] : memref<16x32xf32, #tpu.memory_space<vmem>>, vector<16x32xf32>
    tpu.vector_store %arg4[%c0_52, %c0_53], %243 {strides = array<i32>} : memref<16x32xf32, #tpu.memory_space<vmem>>, vector<16x32xf32>,
    return
  }
  func.func @transform_0(%arg0: i32) -> (i32, i32) {
    %c0_i32 = arith.constant 0 : i32
    %c0_i32_0 = arith.constant 0 : i32
    %c0_i32_1 = arith.constant 0 : i32
    return %c0_i32, %c0_i32_0 : i32, i32
  }
  func.func @transform_1(%arg0: i32) -> (i32, i32) {
    %c0_i32 = arith.constant 0 : i32
    %c0_i32_0 = arith.constant 0 : i32
    %c0_i32_1 = arith.constant 0 : i32
    return %c0_i32, %c0_i32_0 : i32, i32
  }
  func.func @transform_2(%arg0: i32) -> (i32, i32) {
    %c0_i32 = arith.constant 0 : i32
    %c0_i32_0 = arith.constant 0 : i32
    %c0_i32_1 = arith.constant 0 : i32
    return %c0_i32, %c0_i32_0 : i32, i32
  }
  func.func @transform_3(%arg0: i32) -> (i32, i32) {
    %c0_i32 = arith.constant 0 : i32
    %c0_i32_0 = arith.constant 0 : i32
    %c0_i32_1 = arith.constant 0 : i32
    return %c0_i32, %c0_i32_0 : i32, i32
  }
}

</mosaic_0001>

<bundles_post_ra>
// kernel: tpu_custom_call.1
= control target key start
LH: loop header
LB: loop body
LE: loop exit
PB: predicated region body
PF: predicated region fallthrough
CT: control target
= control target key end

     0   :  { %8 = vsyncpa [#allocation3], 0  ;;  %s2781_s0 = inlined_call_operand.hbm [shape: f32[20,32], index: 0, kind: input, shape index: {}]   ;;  %s2782_s1 = inlined_call_operand.hbm [shape: f32[2,32], index: 1, kind: input, shape index: {}]   ;;  %s2783_s2 = inlined_call_operand.hbm [shape: f32[48,128], index: 2, kind: input, shape index: {}]   ;;  %s2784_s3 = inlined_call_operand.hbm [shape: f32[16,32], index: 3, kind: output, shape index: {}]  }
   0x1   :  { %9 = vsyncpa [#allocation6], 0 }
   0x2   :  { %10 = vsyncpa [#allocation4], 0  ;;  %s2276_s12 = smov [#allocation5]   ;;  %s2277_s14 = smov [#allocation2]  }
   0x3   :  { %s29_s13 = sshll.u32 %s2276_s12, 4  ;;  %s16_s15 = sshll.u32 %s2277_s14, 4  ;;  %s30_s13 = int_to_ptr.vmem [resolvable:$true] %s29_s13  ;;  %s17_s15 = int_to_ptr.vmem [resolvable:$true] %s16_s15 }
   0x4   :  { %s2198_s16 = scalar_lea.vmem %s30_s13, 32  ;;  %p2203_p1 = scmp.lt.s32.totalorder %s30_s13, %s30_s13 }
   0x5   :  { %p2199_p0 = scmp.ne.s32.totalorder %s30_s13, %s2198_s16  ;;  %p2204_p2 = scmp.lt.s32.totalorder %s2198_s16, %s2198_s16 }
   0x7   :  { %p2205_p3 = por %p2204_p2, %p2203_p1 }
   0x9   :  { %p2206_p4 = pnand %p2205_p3, %p2199_p0 }
   0xb   :  { %2209 = shalt.err (!%p2206_p4)
}
   0xc   :  { %32 = dma.hbm_to_vmem [thread:$0]  %s2782_s1, 32, %s30_s13, [#allocation6]  }
   0xd   :  { %s2218_s19 = scalar_lea.vmem %s17_s15, 384  ;;  %p2223_p6 = scmp.lt.s32.totalorder %s17_s15, %s17_s15 }
   0xe   :  { %p2219_p5 = scmp.ne.s32.totalorder %s17_s15, %s2218_s19  ;;  %p2224_p7 = scmp.lt.s32.totalorder %s2218_s19, %s2218_s19 }
  0x10   :  { %p2225_p8 = por %p2224_p7, %p2223_p6 }
  0x12   :  { %p2226_p9 = pnand %p2225_p8, %p2219_p5 }
  0x14   :  { %2229 = shalt.err (!%p2226_p9)
}
  0x15   :  { %s2278_s20 = smov 128   ;;  %s2279_s21 = smov 8  }
  0x16   :  { %22 = dma.hbm_to_vmem [thread:$0]  %s2781_s0, 384, %s17_s15, [#allocation3], %s2278_s20, %s2278_s20, %s2279_s21  }
  0x17   :  { %s2280_s24 = smov [#allocation7]  }
  0x18   :  { %s38_s25 = sshll.u32 %s2280_s24, 4  ;;  %s39_s25 = int_to_ptr.vmem [resolvable:$true] %s38_s25 }
  0x19   :  { %s2238_s1 = scalar_lea.vmem %s39_s25, 768  ;;  %p2243_p11 = scmp.lt.s32.totalorder %s39_s25, %s39_s25 }
  0x1a   :  { %p2239_p10 = scmp.ne.s32.totalorder %s39_s25, %s2238_s1  ;;  %p2244_p12 = scmp.lt.s32.totalorder %s2238_s1, %s2238_s1 }
  0x1c   :  { %p2245_p13 = por %p2244_p12, %p2243_p11 }
  0x1e   :  { %p2246_p0 = pnand %p2245_p13, %p2239_p10 }
  0x20   :  { %2249 = shalt.err (!%p2246_p0)
}
  0x21   :  { %44 = dma.hbm_to_vmem [thread:$0]  %s2783_s2, 768, %s39_s25, [#allocation6], %s2278_s20, %s2278_s20, %s2279_s21  }
  0x22   :  { %2270 = dma.done.wait [#allocation3], 384  }
  0x23   :  { %2271 = vsyncadd [#allocation3], 4294966912 }
  0x24   :  { %2272 = dma.done.wait [#allocation6], 800  }
  0x25   :  { %2273 = vsyncadd [#allocation6], 4294966496  ;;  %v2281_v0 = vmov 32   ;;  %vm76_vm0 = vcmask 1043456   ;;  %vm63_vm1 = vcmask 162816   ;;  %v61_v2 = vld [vmem:[#allocation2 + $0x8] sm:$0xff] }
  0x26   :  { %2133 = vset.pattern.permute.xlu0 %v2281_v0  ;;  %v62_v1 = vld [vmem:[#allocation2 + $0x10] sm:$0xf]  ;;  %v60_v3 = vld [vmem:[#allocation2] sm:$0xff]  ;;  %v2338_v5 = vand.u32 4294901760, %v61_v2  ;;  %vm701_vm2 = vcmask 130048   ;;  %s2282_s0 = smov 112  }
  0x27   :  { %v78_v4 = vsel %vm76_vm0, %v62_v1, 0  ;;  %v2340_v6 = vand.u32 4294901760, %v60_v3  ;;  %v2342_v7 = vld [vmem:[#allocation7] sm:$0xff]  ;;  %v2344_v8 = vld [vmem:[#allocation7 + $0x8] sm:$0xff]  ;;  %v56_v9 = vld [vmem:[#allocation7 + $0x10] sm:$0xff]  ;;  %vm722_vm3 = vcmask 7168  }
  0x28   :  { %v2346_v10 = vand.u32 4294901760, %v78_v4  ;;  %v65_v11 = vsel %vm63_vm1, %v2342_v7, 0  ;;  %v68_v12 = vsel %vm63_vm1, %v2344_v8, 0  ;;  %v71_v13 = vsel %vm63_vm1, %v56_v9, 0  ;;  %v57_v14 = vld [vmem:[#allocation7 + $0x18] sm:$0xff]  ;;  %682 = vperm.xlu0 %2133, %v2342_v7   ;;  %s2285_s2 = smov 80  }
  0x29   :  { %v2354_v15 = vand.u32 4294901760, %v65_v11  ;;  %v2356_v16 = vand.u32 4294901760, %v68_v12  ;;  %v223_v17 = vsub.f32 %v61_v2, %v2338_v5  ;;  %v2359_v18 = vand.u32 4294901760, %v71_v13  ;;  %s2287_s28 = smov 48   ;;  %s2290_s29 = smov 126  }
  0x2a   :  { %1896 = vmatprep.subr.mxu0 %v2346_v10  ;;  %v216_v19 = vsub.f32 %v78_v4, %v2346_v10  ;;  %v230_v20 = vsub.f32 %v60_v3, %v2340_v6  ;;  %v74_v21 = vsel %vm63_vm1, %v57_v14, 0  ;;  %vm1019_vm6 = vcmask 654336   ;;  %s2291_s30 = smov 30   ;;  %s2292_s4 = smov 31  }
  0x2b   :  { %1897 = vmatpush3.msra.mxu0 %v2346_v10  ;;  %v2367_v22 = vsub.f32 %v65_v11, %v2354_v15  ;;  %v2370_v23 = vsub.f32 %v68_v12, %v2356_v16  ;;  %v2372_v24 = vand.u32 4294901760, %v223_v17  ;;  %v2375_v25 = vsub.f32 %v71_v13, %v2359_v18  ;;  %1914 = vmatprep.mubr.f32.mxu1 %v2354_v15  ;;  %s2293_s5 = smov 1   ;;  %s2294_s6 = smov 127  }
  0x2c   :  { %1898 = vmatprep.subr.mxu0 %v2338_v5  ;;  %v217_v26 = vand.u32 4294901760, %v216_v19  ;;  %v231_v27 = vand.u32 4294901760, %v230_v20  ;;  %v2379_v28 = vand.u32 4294901760, %v74_v21  ;;  %686 = vperm.xlu0 %2133, %v2344_v8   ;;  %vm867_vm7 = vcmask 261120   ;;  %s2295_s7 = smov 2   ;;  %s2296_s8 = smov 97  }
  0x2d   :  { %1899 = vmatpush3.msra.mxu0 %v2338_v5  ;;  %v150_v29 = vand.u32 4294901760, %v2367_v22  ;;  %v160_v30 = vand.u32 4294901760, %v2370_v23  ;;  %v225_v31 = vsub.f32 %v223_v17, %v2372_v24  ;;  %v170_v32 = vand.u32 4294901760, %v2375_v25  ;;  %s2297_s9 = smov 98   ;;  %s2302_s10 = smov [#allocation8]  }
  0x2e   :  { %1900 = vmatprep.subr.mxu0 %v2340_v6  ;;  %v218_v33 = vsub.f32 %v216_v19, %v217_v26  ;;  %v232_v34 = vsub.f32 %v230_v20, %v231_v27  ;;  %v179_v35 = vsub.f32 %v74_v21, %v2379_v28  ;;  %vm1002_vm12 = vcmask 244736   ;;  %s1769_s11 = sshll.u32 %s2302_s10, 4  ;;  %s1770_s11 = int_to_ptr.vmem [resolvable:$true] %s1769_s11 }
  0x2f   :  { %1901 = vmatpush3.msra.mxu0 %v2340_v6  ;;  %v151_v36 = vsub.f32 %v2367_v22, %v150_v29  ;;  %v161_v37 = vsub.f32 %v2370_v23, %v160_v30  ;;  %v171_v38 = vsub.f32 %v2375_v25, %v170_v32  ;;  %v226_v40 = vand.u32 4294901760, %v225_v31  ;;  %s2250_s12 = scalar_lea.vmem %s1770_s11, 256  ;;  %p2255_p2 = scmp.lt.s32.totalorder %s1770_s11, %s1770_s11 }
  0x30   :  { %v219_v39 = vand.u32 4294901760, %v218_v33  ;;  %1920 = vmatprep.subr.mxu0 %v216_v19  ;;  %v180_v41 = vand.u32 4294901760, %v179_v35  ;;  %v233_v45 = vand.u32 4294901760, %v232_v34  ;;  %vm981_vm14 = vcmask 252928   ;;  %p2251_p1 = scmp.ne.s32.totalorder %s1770_s11, %s2250_s12  ;;  %p2256_p3 = scmp.lt.s32.totalorder %s2250_s12, %s2250_s12 }
  0x31   :  { %v152_v42 = vand.u32 4294901760, %v151_v36  ;;  %v162_v43 = vand.u32 4294901760, %v161_v37  ;;  %v172_v44 = vand.u32 4294901760, %v171_v38  ;;  %v2283_v36 = vmov 0  }
  0x32   :  { %1908 = vmatprep.subr.mxu1 %v219_v39  ;;  %v181_v46 = vsub.f32 %v179_v35, %v180_v41  ;;  %2134 = vset.pattern.permute.xlu1 %v2283_v36  ;;  %v2284_v37 = vmov 1   ;;  %vm940_vm1 = vcmask 15360   ;;  %p2257_p4 = por %p2256_p3, %p2255_p2 }
  0x33   :  { %1902 = vmatprep.mubr.f32.mxu0 %v152_v42  ;;  %1909 = vmatpush3.msra.mxu1 %v219_v39 }
  0x34   :  { %1903 = vmatmul.mubr.f32.vlgmr.msra.gmra.mxu0 %v162_v43  ;;  %1910 = vmatprep.subr.mxu1 %v226_v40  ;;  %v182_v47 = vand.u32 4294901760, %v181_v46  ;;  %v832_v46 = vld [vmem:[#allocation5] sm:$0x3]  ;;  %p2258_p5 = pnand %p2257_p4, %p2251_p1 }
  0x35   :  { %1911 = vmatpush3.msra.mxu1 %v226_v40  ;;  %1905 = vmatprep.mubr.f32.mxu0 %v172_v44  ;;  %vm833_vm5 = vcmp.gt.f32.partialorder %v832_v46, 20.0 }
  0x36   :  { %1912 = vmatprep.subr.mxu1 %v233_v45  ;;  %1921 = vmatpush3.msra.mxu0 %v216_v19 }
  0x37   :  { %1913 = vmatpush3.msra.mxu1 %v233_v45  ;;  %1922 = vmatprep.subr.mxu0 %v223_v17 }
  0x38   :  { %1906 = vmatmul.mubr.f32.gmra.mxu0 %v182_v47  ;;  %1915 = vmatmul.mubr.f32.vlgmr.msra.gmra.mxu1 %v2356_v16  ;;  %v834_v47 = vmin.f32 %v832_v46, 20.0 }
  0x39   :  { %1923 = vmatpush3.msra.mxu0 %v223_v17  ;;  %1932 = vmatprep.subr.mxu1 %v2346_v10 }
  0x3a   :  { %1924 = vmatprep.subr.mxu0 %v230_v20  ;;  %1933 = vmatpush3.msra.mxu1 %v2346_v10 }
  0x3b   :  { %1925 = vmatpush3.msra.mxu0 %v230_v20  ;;  %1926 = vmatprep.mubr.f32.mxu0 %v2367_v22 }
  0x3c   :  { %1917 = vmatprep.mubr.f32.mxu1 %v2359_v18  ;;  %1927 = vmatmul.mubr.f32.vlgmr.msra.gmra.mxu0 %v2370_v23 }
  0x3d   :  { %1934 = vmatprep.subr.mxu1 %v2338_v5  ;;  %1918 = vmatmul.mubr.f32.gmra.mxu1 %v2379_v28 }
  0x3e   :  { %1935 = vmatpush3.msra.mxu1 %v2338_v5  ;;  %1944 = vmatprep.subr.mxu0 %v217_v26 }
  0x3f   :  { %1929 = vmatprep.mubr.f32.mxu0 %v2375_v25  ;;  %1936 = vmatprep.subr.mxu1 %v2340_v6 }
  0x40   :  { %1945 = vmatpush3.msra.mxu0 %v217_v26  ;;  %1937 = vmatpush3.msra.mxu1 %v2340_v6 }
  0x41   :  { %1930 = vmatmul.mubr.f32.gmra.mxu0 %v179_v35  ;;  %1938 = vmatprep.mubr.f32.mxu1 %v150_v29 }
  0x42   :  { %1946 = vmatprep.subr.mxu0 %v2372_v24  ;;  %1939 = vmatmul.mubr.f32.vlgmr.msra.gmra.mxu1 %v160_v30 }
  0x43   :  { %1947 = vmatpush3.msra.mxu0 %v2372_v24  ;;  %1956 = vmatprep.subr.mxu1 %v2346_v10 }
  0x44   :  { %1948 = vmatprep.subr.mxu0 %v231_v27  ;;  %1957 = vmatpush3.msra.mxu1 %v2346_v10 }
  0x45   :  { %1949 = vmatpush3.msra.mxu0 %v231_v27  ;;  %1950 = vmatprep.mubr.f32.mxu0 %v2354_v15 }
  0x46   :  { %1941 = vmatprep.mubr.f32.mxu1 %v170_v32  ;;  %1951 = vmatmul.mubr.f32.vlgmr.msra.gmra.mxu0 %v2356_v16 }
  0x47   :  { %1958 = vmatprep.subr.mxu1 %v2338_v5  ;;  %1942 = vmatmul.mubr.f32.gmra.mxu1 %v180_v41 }
  0x48   :  { %1959 = vmatpush3.msra.mxu1 %v2338_v5  ;;  %1953 = vmatprep.mubr.f32.mxu0 %v2359_v18 }
  0x49   :  { %1960 = vmatprep.subr.mxu1 %v2340_v6  ;;  %1962 = vmatprep.mubr.f32.mxu1 %v2354_v15 }
  0x4a   :  { %1954 = vmatmul.mubr.f32.gmra.mxu0 %v2379_v28  ;;  %1961 = vmatpush3.msra.mxu1 %v2340_v6 }
  0x4b   :  { %1963 = vmatmul.mubr.f32.vlgmr.msra.gmra.mxu1 %v2356_v16  ;;  %2135 = vset.pattern.permute.xlu0 %v2284_v37 }
  0x4c   :  { %1965 = vmatprep.mubr.f32.mxu1 %v2359_v18 }
  0x4f   :  { %1966 = vmatmul.mubr.f32.gmra.mxu1 %v2379_v28 }
  0xa3   :  { %v683_v17 = vpop.permute.xlu0 %682 }
  0xa7   :  { %v687_v28 = vpop.permute.xlu0 %686 }
  0xf4   :  { %v1904_v48 = vpop.f32.mrf.mxu0 }
  0xf6   :  { %v154_v49 = vpop.f32.mrf.mxu0 }
  0xf8   :  { %v1907_v50 = vpop.f32.mrf.mxu0  ;;  %v1916_v51 = vpop.f32.mrf.mxu1 }
  0xf9   :  { %v277_v1 = vadd.f32 %v1916_v51, %v1904_v48  ;;  %v835_v48 = vmul.f32 1.442695, %v834_v47 }
  0xfa   :  { %v174_v52 = vpop.f32.mrf.mxu0  ;;  %v270_v53 = vpop.f32.mrf.mxu1 }
  0xfb   :  { %v271_v61 = vadd.f32 %v270_v53, %v154_v49  ;;  %2154 = vpow2.f32 %v835_v48 }
  0xfc   :  { %v1928_v54 = vpop.f32.mrf.mxu0 }
  0xfd   :  { %v1919_v55 = vpop.f32.mrf.mxu1  ;;  %v374_v9 = vadd.f32 %v1928_v54, %v277_v1 }
  0xfe   :  { %v289_v56 = vadd.f32 %v1919_v55, %v1907_v50  ;;  %v366_v57 = vpop.f32.mrf.mxu0 }
  0xff   :  { %v282_v58 = vpop.f32.mrf.mxu1  ;;  %v367_v4 = vadd.f32 %v366_v57, %v271_v61 }
 0x100   :  { %v283_v59 = vadd.f32 %v282_v58, %v174_v52 }
 0x101   :  { %v1931_v60 = vpop.f32.mrf.mxu0 }
 0x102   :  { %v388_v62 = vadd.f32 %v1931_v60, %v289_v56  ;;  %v1940_v63 = vpop.f32.mrf.mxu1 }
 0x103   :  { %v380_v0 = vpop.f32.mrf.mxu0  ;;  %v472_v14 = vadd.f32 %v1940_v63, %v374_v9 }
 0x104   :  { %v381_v2 = vadd.f32 %v380_v0, %v283_v59  ;;  %v463_v3 = vpop.f32.mrf.mxu1 }
 0x105   :  { %v464_v10 = vadd.f32 %v463_v3, %v367_v4  ;;  %v849_v3 = vlaneseq }
 0x106   :  { %v1952_v5 = vpop.f32.mrf.mxu0 }
 0x107   :  { %v1943_v6 = vpop.f32.mrf.mxu1  ;;  %v574_v22 = vadd.f32 %v1952_v5, %v472_v14  ;;  %v850_v4 = vshrl.u32 %v849_v3, 7 }
 0x108   :  { %v488_v11 = vadd.f32 %v1943_v6, %v388_v62  ;;  %v567_v12 = vpop.f32.mrf.mxu0  ;;  %v2155_v49 = vpop.eup %2154 }
 0x109   :  { %v479_v13 = vpop.f32.mrf.mxu1  ;;  %v568_v20 = vadd.f32 %v567_v12, %v464_v10  ;;  %v837_v50 = vadd.f32 1.0, %v2155_v49  ;;  %v840_v59 = vmul.f32 -0.5, %v2155_v49  ;;  %v843_v62 = vand.u32 2147483647, %v2155_v49 }
 0x10a   :  { %v2421_v15 = vadd.f32 %v479_v13, %v381_v2  ;;  %v1955_v16 = vpop.f32.mrf.mxu0  ;;  %v851_v5 = vsub.s32 0, %v850_v4  ;;  %v876_v6 = vsub.s32 1, %v850_v4 }
 0x10b   :  { %v586_v18 = vadd.f32 %v1955_v16, %v488_v11  ;;  %v1964_v19 = vpop.f32.mrf.mxu1  ;;  %2156 = vlog2.f32 %v837_v50  ;;  %v841_v60 = vadd.f32 1.0, %v840_v59  ;;  %vm844_vm4 = vcmp.lt.f32.partialorder %v843_v62, 0.0004427343 }
 0x10c   :  { %v666_v25 = vadd.f32 %v1964_v19, %v574_v22  ;;  %v58_v19 = vld [vmem:[#allocation7 + $0x20] sm:$0xff]  ;;  %v2286_v22 = vmov 33  }
 0x10d   :  { %v659_v21 = vpop.f32.mrf.mxu1  ;;  %v842_v0 = vmul.f32 %v2155_v49, %v841_v60 }
 0x10e   :  { %v660_v23 = vadd.f32 %v659_v21, %v568_v20  ;;  %v690_v30 = vadd.f32 %v687_v28, %v666_v25  ;;  %v2452_v20 = vsel %vm1019_vm6, %v58_v19, 0 }
 0x10f   :  { %v1967_v24 = vpop.f32.mrf.mxu1  ;;  %v2455_v21 = vand.u32 4294901760, %v2452_v20 }
 0x110   :  { %v689_v26 = vadd.f32 %v683_v17, %v660_v23  ;;  %v2423_v27 = vadd.f32 %v1967_v24, %v586_v18  ;;  %v705_v31 = vsel %vm701_vm2, %v690_v30, 0.0 }
 0x111   :  { %2011 = vmatprep.mubr.f32.mxu1 %v2455_v21 }
 0x112   :  { %710 = vrot.lane.b32.xlu1 %v689_v26, %s2282_s0  ;;  %v702_v29 = vsel %vm701_vm2, %v689_v26, 0.0 }
 0x113   :  { %703 = vadd.xlane.f32.xlu0 %v702_v29 }
 0x116   :  { %712 = vrot.lane.b32.xlu1 %v690_v30, %s2282_s0 }
 0x118   :  { %v2157_v61 = vpop.eup %2156 }
 0x119   :  { %v839_v63 = vmul.f32 0.6931472, %v2157_v61 }
 0x11b   :  { %v845_v1 = vsel %vm844_vm4, %v842_v0, %v839_v63 }
 0x11c   :  { %v846_v2 = vsel %vm833_vm5, %v832_v46, %v845_v1 }
 0x11d   :  { %2158 = vtanh.f32 %v846_v2 }
 0x12a   :  { %v2159_v9 = vpop.eup %2158 }
 0x12b   :  { %v848_v10 = vmul.f32 %v2159_v9, %v832_v46 }
 0x12d   :  { %v852_v11 = vrot.slane %v848_v10, %v851_v5  ;;  %v877_v12 = vrot.slane %v848_v10, %v876_v6 }
 0x13a   :  { %706 = vadd.xlane.f32.xlu1 %v705_v31 }
 0x184   :  { %v711_v32 = vpop.permute.xlu1 %710 }
 0x185   :  { %v716_v33 = vsel %vm701_vm2, %v711_v32, 0.0 }
 0x186   :  { %717 = vadd.xlane.f32.xlu0 %v716_v33 }
 0x188   :  { %v713_v34 = vpop.permute.xlu1 %712 }
 0x189   :  { %v719_v35 = vsel %vm701_vm2, %v713_v34, 0.0  ;;  %v2460_v34 = vld [vmem:[#allocation7 + $0x28] sm:$0xff] }
 0x18a   :  { %720 = vadd.xlane.f32.xlu0 %v719_v35 }
 0x19c   :  { %v704_v38 = vpop.xlane.xlu0 %703 }
 0x1c3   :  { %v707_v40 = vpop.xlane.xlu1 %706 }
 0x20f   :  { %v718_v39 = vpop.xlane.xlu0 %717 }
 0x210   :  { %v723_v42 = vsel %vm722_vm3, %v704_v38, %v718_v39 }
 0x213   :  { %v721_v41 = vpop.xlane.xlu0 %720 }
 0x214   :  { %v724_v43 = vsel %vm722_vm3, %v707_v40, %v721_v41  ;;  %v2288_v40 = vmov 34  }
 0x215   :  { %v725_v44 = vadd.f32 %v724_v43, %v723_v42  ;;  %v2289_v42 = vmov 38  }
 0x217   :  { %v727_v45 = vmul.f32 0.03125, %v725_v44 }
 0x219   :  { %734 = vperm.xlu0 %2135, %v727_v45   ;;  %730 = vperm.xlu1 %2134, %v727_v45  }
 0x21d   :  { %2137 = vset.pattern.permute.xlu0 %v2286_v22 }
 0x294   :  { %v735_v51 = vpop.permute.xlu0 %734  ;;  %v731_v52 = vpop.permute.xlu1 %730 }
 0x295   :  { %v737_v53 = vsel %vm701_vm2, %v731_v52, %v735_v51 }
 0x296   :  { %v2436_v54 = vsub.f32 %v689_v26, %v737_v53  ;;  %v2438_v55 = vsub.f32 %v690_v30, %v737_v53 }
 0x298   :  { %v740_v56 = vmul.f32 %v2436_v54, %v2436_v54  ;;  %v741_v57 = vmul.f32 %v2438_v55, %v2438_v55 }
 0x29a   :  { %750 = vrot.lane.b32.xlu1 %v740_v56, %s2282_s0  ;;  %v745_v58 = vsel %vm701_vm2, %v741_v57, 0.0  ;;  %v742_v13 = vsel %vm701_vm2, %v740_v56, 0.0 }
 0x29b   :  { %746 = vadd.xlane.f32.xlu0 %v745_v58 }
 0x29e   :  { %752 = vrot.lane.b32.xlu1 %v741_v57, %s2282_s0 }
 0x2b1   :  { %879 = vrot.lane.b32.xlu0 %v877_v12, %s2285_s2 }
 0x2c2   :  { %743 = vadd.xlane.f32.xlu1 %v742_v13 }
 0x30c   :  { %v751_v14 = vpop.permute.xlu1 %750 }
 0x30d   :  { %v756_v16 = vsel %vm701_vm2, %v751_v14, 0.0 }
 0x30e   :  { %757 = vadd.xlane.f32.xlu1 %v756_v16 }
 0x310   :  { %v753_v17 = vpop.permute.xlu1 %752 }
 0x311   :  { %v759_v18 = vsel %vm701_vm2, %v753_v17, 0.0 }
 0x312   :  { %760 = vadd.xlane.f32.xlu1 %v759_v18 }
 0x323   :  { %854 = vrot.lane.b32.xlu1 %v852_v11, %s2285_s2 }
 0x324   :  { %v747_v25 = vpop.xlane.xlu0 %746 }
 0x328   :  { %v880_v38 = vpop.permute.xlu0 %879 }
 0x329   :  { %v883_v39 = vmul.f32 %v880_v38, %v2460_v34  ;;  %v882_v41 = vmul.f32 %v880_v38, %v58_v19 }
 0x34b   :  { %v744_v23 = vpop.xlane.xlu1 %743 }
 0x397   :  { %v758_v24 = vpop.xlane.xlu1 %757 }
 0x398   :  { %v762_v28 = vsel %vm722_vm3, %v744_v23, %v758_v24 }
 0x39b   :  { %v761_v26 = vpop.xlane.xlu1 %760 }
 0x39c   :  { %v763_v29 = vsel %vm722_vm3, %v747_v25, %v761_v26 }
 0x39d   :  { %v764_v30 = vadd.f32 %v763_v29, %v762_v28 }
 0x39f   :  { %v765_v31 = vmul.f32 0.03125, %v764_v30  ;;  %v855_v32 = vpop.permute.xlu1 %854 }
 0x3a0   :  { %v857_v33 = vmul.f32 %v855_v32, %v58_v19  ;;  %v858_v35 = vmul.f32 %v855_v32, %v2460_v34 }
 0x3a1   :  { %768 = vperm.xlu1 %2134, %v765_v31  }
 0x3a2   :  { %861 = vrot.lane.b32.xlu0 %v857_v33, %s2287_s28 }
 0x3a5   :  { %2136 = vset.pattern.permute.xlu1 %v2284_v37 }
 0x3a6   :  { %772 = vperm.xlu1 %2136, %v765_v31   ;;  %785 = vperm.xlu0 %2137, %v2344_v8  }
 0x3aa   :  { %863 = vrot.lane.b32.xlu1 %v858_v35, %s2287_s28  ;;  %2140 = vset.pattern.permute.xlu0 %v2288_v40 }
 0x3ab   :  { %2138 = vset.pattern.permute.xlu1 %v2286_v22  ;;  %791 = vperm.xlu0 %2140, %v2342_v7  }
 0x3ae   :  { %888 = vrot.lane.b32.xlu1 %v883_v39, %s2287_s28 }
 0x3af   :  { %2142 = vset.pattern.permute.xlu0 %v2289_v42 }
 0x3b2   :  { %886 = vrot.lane.b32.xlu1 %v882_v41, %s2287_s28 }
 0x3b6   :  { %781 = vperm.xlu1 %2138, %v2342_v7  }
 0x3ba   :  { %2139 = vset.pattern.permute.xlu1 %v2288_v40 }
 0x3bb   :  { %795 = vperm.xlu1 %2139, %v2344_v8  }
 0x3bf   :  { %2141 = vset.pattern.permute.xlu1 %v2289_v42 }
 0x414   :  { %v862_v48 = vpop.permute.xlu0 %861 }
 0x415   :  { %v868_v50 = vsel %vm867_vm7, %v862_v48, 0.0 }
 0x41c   :  { %v769_v43 = vpop.permute.xlu1 %768 }
 0x421   :  { %v773_v44 = vpop.permute.xlu1 %772  ;;  %v786_v60 = vpop.permute.xlu0 %785 }
 0x422   :  { %v775_v45 = vsel %vm701_vm2, %v769_v43, %v773_v44 }
 0x423   :  { %v776_v56 = vadd.f32 1e-05, %v775_v45 }
 0x425   :  { %v864_v46 = vpop.permute.xlu1 %863  ;;  %2160 = vrsqrt.f32 %v776_v56 }
 0x426   :  { %v871_v47 = vsel %vm867_vm7, %v864_v46, 0.0  ;;  %v792_v4 = vpop.permute.xlu0 %791 }
 0x427   :  { %872 = vadd.xlane.f32.xlu1 %v871_v47 }
 0x429   :  { %v889_v49 = vpop.permute.xlu1 %888 }
 0x42a   :  { %v895_v51 = vsel %vm867_vm7, %v889_v49, 0.0 }
 0x42b   :  { %869 = vadd.xlane.f32.xlu1 %v868_v50  ;;  %896 = vadd.xlane.f32.xlu0 %v895_v51 }
 0x42d   :  { %v887_v52 = vpop.permute.xlu1 %886 }
 0x42e   :  { %v892_v53 = vsel %vm867_vm7, %v887_v52, 0.0  ;;  %v2496_v52 = vsub.f32 %v2452_v20, %v2455_v21  ;;  %v2298_v20 = vmov 35  }
 0x42f   :  { %893 = vadd.xlane.f32.xlu0 %v892_v53 }
 0x430   :  { %v1103_v53 = vand.u32 4294901760, %v2496_v52 }
 0x431   :  { %v782_v58 = vpop.permute.xlu1 %781 }
 0x432   :  { %v2161_v57 = vpop.eup %2160  ;;  %v1104_v56 = vsub.f32 %v2496_v52, %v1103_v53 }
 0x433   :  { %v779_v59 = vmul.f32 %v2161_v57, %v2438_v55  ;;  %v778_v0 = vmul.f32 %v2161_v57, %v2436_v54 }
 0x434   :  { %v1105_v57 = vand.u32 4294901760, %v1104_v56 }
 0x435   :  { %v789_v61 = vmul.f32 %v786_v60, %v779_v59  ;;  %v788_v2 = vmul.f32 %v782_v58, %v778_v0  ;;  %v913_v58 = vand.u32 127, %v849_v3 }
 0x436   :  { %v796_v62 = vpop.permute.xlu1 %795  ;;  %1988 = vmatprep.mubr.f32.mxu0 %v1105_v57 }
 0x437   :  { %v799_v63 = vadd.f32 %v796_v62, %v789_v61  ;;  %v798_v6 = vadd.f32 %v792_v4, %v788_v2  ;;  %v2513_v59 = vand.u32 15, %v913_v58 }
 0x439   :  { %v803_v1 = vmin.f32 %v799_v63, 20.0  ;;  %v802_v9 = vmin.f32 %v798_v6, 20.0  ;;  %vm801_vm9 = vcmp.gt.f32.partialorder %v799_v63, 20.0  ;;  %vm800_vm11 = vcmp.gt.f32.partialorder %v798_v6, 20.0 }
 0x43a   :  { %v1005_v60 = vadd.s32 2, %v2513_v59 }
 0x43b   :  { %v806_v5 = vmul.f32 1.442695, %v803_v1  ;;  %v804_v10 = vmul.f32 1.442695, %v802_v9 }
 0x43c   :  { %907 = vperm.xlu1 %2141, %v2344_v8   ;;  %vm1007_vm13 = vcmp.lt.s32.totalorder %v1005_v60, 16 }
 0x43d   :  { %2162 = vpow2.f32 %v806_v5 }
 0x43e   :  { %2164 = vpow2.f32 %v804_v10 }
 0x440   :  { %2143 = vset.pattern.permute.xlu1 %v2298_v20 }
 0x445   :  { %903 = vperm.xlu0 %2142, %v2342_v7  }
 0x449   :  { %2144 = vset.pattern.permute.xlu0 %v2298_v20 }
 0x44a   :  { %v2163_v11 = vpop.eup %2162 }
 0x44b   :  { %v817_v12 = vadd.f32 1.0, %v2163_v11  ;;  %v2165_v13 = vpop.eup %2164  ;;  %v820_v14 = vmul.f32 -0.5, %v2163_v11  ;;  %v823_v18 = vand.u32 2147483647, %v2163_v11 }
 0x44c   :  { %v808_v55 = vadd.f32 1.0, %v2165_v13  ;;  %v811_v22 = vmul.f32 -0.5, %v2165_v13  ;;  %v814_v28 = vand.u32 2147483647, %v2165_v13 }
 0x44d   :  { %2166 = vlog2.f32 %v817_v12  ;;  %v821_v17 = vadd.f32 1.0, %v820_v14  ;;  %vm824_vm8 = vcmp.lt.f32.partialorder %v823_v18, 0.0004427343 }
 0x44e   :  { %2168 = vlog2.f32 %v808_v55  ;;  %v812_v25 = vadd.f32 1.0, %v811_v22  ;;  %vm815_vm10 = vcmp.lt.f32.partialorder %v814_v28, 0.0004427343  ;;  %v963_v28 = vadd.s32 4294967295, %v2513_v59 }
 0x44f   :  { %v822_v19 = vmul.f32 %v2163_v11, %v821_v17  ;;  %v984_v11 = vadd.s32 1, %v2513_v59 }
 0x450   :  { %v813_v30 = vmul.f32 %v2165_v13, %v812_v25  ;;  %vm964_vm0 = vcmp.ge.s32.totalorder %v963_v28, 0 }
 0x451   :  { %vm986_vm15 = vcmp.lt.s32.totalorder %v984_v11, 16 }
 0x45a   :  { %v2167_v16 = vpop.eup %2166 }
 0x45b   :  { %v819_v54 = vmul.f32 0.6931472, %v2167_v16  ;;  %v2169_v24 = vpop.eup %2168 }
 0x45c   :  { %v810_v29 = vmul.f32 0.6931472, %v2169_v24  ;;  %v1024_v24 = vsel %vm1019_vm6, %v2460_v34, 0 }
 0x45d   :  { %v825_v23 = vsel %vm824_vm8, %v822_v19, %v819_v54 }
 0x45e   :  { %v827_v26 = vsel %vm801_vm9, %v799_v63, %v825_v23  ;;  %v816_v31 = vsel %vm815_vm10, %v813_v30, %v810_v29 }
 0x45f   :  { %2170 = vtanh.f32 %v827_v26  ;;  %v826_v32 = vsel %vm800_vm11, %v798_v6, %v816_v31 }
 0x460   :  { %2172 = vtanh.f32 %v826_v32 }
 0x46c   :  { %v2171_v35 = vpop.eup %2170 }
 0x46d   :  { %v831_v40 = vmul.f32 %v2171_v35, %v799_v63  ;;  %v2173_v46 = vpop.eup %2172 }
 0x46e   :  { %v830_v48 = vmul.f32 %v2173_v46, %v798_v6 }
 0x4b0   :  { %v873_v33 = vpop.xlane.xlu1 %872 }
 0x4b4   :  { %v897_v38 = vpop.xlane.xlu0 %896  ;;  %v870_v39 = vpop.xlane.xlu1 %869 }
 0x4b5   :  { %v899_v41 = vsel %vm701_vm2, %v873_v33, %v897_v38  ;;  %v2563_v33 = vand.u32 4294901760, %v1024_v24 }
 0x4b6   :  { %v901_v42 = vadd.f32 %v899_v41, %v831_v40 }
 0x4b7   :  { %v2587_v46 = vsub.f32 %v1024_v24, %v2563_v33 }
 0x4b8   :  { %v908_v43 = vpop.permute.xlu1 %907  ;;  %v894_v44 = vpop.xlane.xlu0 %893 }
 0x4b9   :  { %v2479_v45 = vadd.f32 %v908_v43, %v901_v42  ;;  %v898_v47 = vsel %vm701_vm2, %v870_v39, %v894_v44 }
 0x4ba   :  { %v900_v49 = vadd.f32 %v898_v47, %v830_v48 }
 0x4bb   :  { %992 = vrot.lane.b32.xlu1 %v2479_v45, %s2290_s29  ;;  %v2540_v17 = vand.u32 4294901760, %v2479_v45 }
 0x4bd   :  { %v2556_v30 = vsub.f32 %v2479_v45, %v2540_v17 }
 0x4bf   :  { %998 = vrot.lane.b32.xlu1 %v2479_v45, %s2291_s30  ;;  %v2577_v42 = vand.u32 4294901760, %v2556_v30 }
 0x4c0   :  { %v904_v50 = vpop.permute.xlu0 %903 }
 0x4c1   :  { %v2484_v51 = vadd.f32 %v904_v50, %v900_v49  ;;  %v1165_v20 = vsub.f32 %v2556_v30, %v2577_v42 }
 0x4c3   :  { %975 = vrot.lane.b32.xlu0 %v2484_v51, %s2292_s4  ;;  %990 = vrot.lane.b32.xlu1 %v2484_v51, %s2290_s29  ;;  %v2547_v23 = vand.u32 4294901760, %v2484_v51  ;;  %v1166_v11 = vand.u32 4294901760, %v1165_v20 }
 0x4c5   :  { %v2569_v35 = vsub.f32 %v2484_v51, %v2547_v23 }
 0x4c7   :  { %957 = vrot.lane.b32.xlu0 %v2479_v45, %s2293_s5  ;;  %996 = vrot.lane.b32.xlu1 %v2484_v51, %s2291_s30  ;;  %v2592_v48 = vand.u32 4294901760, %v2569_v35 }
 0x4cb   :  { %955 = vrot.lane.b32.xlu0 %v2484_v51, %s2293_s5  ;;  %971 = vrot.lane.b32.xlu1 %v2479_v45, %s2294_s6 }
 0x4cf   :  { %936 = vrot.lane.b32.xlu0 %v2479_v45, %s2295_s7  ;;  %977 = vrot.lane.b32.xlu1 %v2479_v45, %s2292_s4 }
 0x4d3   :  { %934 = vrot.lane.b32.xlu0 %v2484_v51, %s2295_s7  ;;  %969 = vrot.lane.b32.xlu1 %v2484_v51, %s2294_s6 }
 0x4d7   :  { %951 = vrot.lane.b32.xlu1 %v2479_v45, %s2296_s8  ;;  %1016 = vperm.xlu0 %2144, %v2344_v8  }
 0x4db   :  { %949 = vrot.lane.b32.xlu1 %v2484_v51, %s2296_s8  ;;  %2146 = vset.pattern.permute.xlu0 %v2284_v37 }
 0x4df   :  { %930 = vrot.lane.b32.xlu1 %v2479_v45, %s2297_s9 }
 0x4e3   :  { %928 = vrot.lane.b32.xlu1 %v2484_v51, %s2297_s9  ;;  %v943_v51 = vadd.s32 4294967294, %v2513_v59 }
 0x4e5   :  { %vm944_vm4 = vcmp.ge.s32.totalorder %v943_v51, 0 }
 0x4e7   :  { %1012 = vperm.xlu1 %2143, %v2342_v7  }
 0x4eb   :  { %2145 = vset.pattern.permute.xlu1 %v2283_v36 }
 0x52d   :  { %v993_v61 = vpop.permute.xlu1 %992 }
 0x531   :  { %v999_v62 = vpop.permute.xlu1 %998 }
 0x532   :  { %v1004_v63 = vsel %vm1002_vm12, %v993_v61, %v999_v62  ;;  %v1113_v61 = vand.u32 4294901760, %v2587_v46 }
 0x533   :  { %v1010_v0 = vsel %vm1007_vm13, %v1004_v63, 0.0 }
 0x534   :  { %v2516_v1 = vand.u32 4294901760, %v1010_v0 }
 0x535   :  { %v991_v8 = vpop.permute.xlu1 %990  ;;  %v976_v12 = vpop.permute.xlu0 %975 }
 0x536   :  { %v2519_v7 = vsub.f32 %v1010_v0, %v2516_v1  ;;  %1968 = vmatprep.subr.mxu0 %v2516_v1  ;;  %v1172_v0 = vsub.f32 %v2569_v35, %v2592_v48 }
 0x537   :  { %1969 = vmatpush3.msra.mxu0 %v2516_v1 }
 0x538   :  { %v2524_v3 = vand.u32 4294901760, %v2519_v7 }
 0x539   :  { %v997_v2 = vpop.permute.xlu1 %996  ;;  %v958_v19 = vpop.permute.xlu0 %957 }
 0x53a   :  { %v1003_v4 = vsel %vm1002_vm12, %v991_v8, %v997_v2  ;;  %v1137_v5 = vsub.f32 %v2519_v7, %v2524_v3 }
 0x53b   :  { %v1009_v6 = vsel %vm1007_vm13, %v1003_v4, 0.0 }
 0x53c   :  { %v2528_v9 = vand.u32 4294901760, %v1009_v6  ;;  %v1138_v10 = vand.u32 4294901760, %v1137_v5 }
 0x53d   :  { %v972_v13 = vpop.permute.xlu1 %971  ;;  %v956_v40 = vpop.permute.xlu0 %955 }
 0x53e   :  { %v2532_v55 = vsub.f32 %v1009_v6, %v2528_v9  ;;  %1970 = vmatprep.subr.mxu0 %v2528_v9  ;;  %1991 = vmatprep.subr.mxu1 %v1138_v10 }
 0x53f   :  { %1971 = vmatpush3.msra.mxu0 %v2528_v9  ;;  %1992 = vmatpush3.msra.mxu1 %v1138_v10 }
 0x540   :  { %v2537_v14 = vand.u32 4294901760, %v2532_v55 }
 0x541   :  { %v978_v16 = vpop.permute.xlu1 %977  ;;  %v937_v62 = vpop.permute.xlu0 %936 }
 0x542   :  { %v983_v18 = vsel %vm981_vm14, %v972_v13, %v978_v16  ;;  %v1144_v54 = vsub.f32 %v2532_v55, %v2537_v14  ;;  %v1114_v16 = vsub.f32 %v2587_v46, %v1113_v61 }
 0x543   :  { %v989_v22 = vsel %vm986_vm15, %v983_v18, 0.0 }
 0x544   :  { %v2551_v25 = vand.u32 4294901760, %v989_v22  ;;  %v1145_v26 = vand.u32 4294901760, %v1144_v54  ;;  %v1173_v54 = vand.u32 4294901760, %v1172_v0 }
 0x545   :  { %v970_v29 = vpop.permute.xlu1 %969 }
 0x546   :  { %v2559_v31 = vsub.f32 %v989_v22, %v2551_v25  ;;  %v982_v32 = vsel %vm981_vm14, %v970_v29, %v976_v12  ;;  %1972 = vmatprep.subr.mxu0 %v2551_v25  ;;  %1993 = vmatprep.subr.mxu1 %v1145_v26  ;;  %v935_v22 = vpop.permute.xlu0 %934 }
 0x547   :  { %v988_v34 = vsel %vm986_vm15, %v982_v32, 0.0  ;;  %1973 = vmatpush3.msra.mxu0 %v2551_v25  ;;  %1994 = vmatpush3.msra.mxu1 %v1145_v26 }
 0x548   :  { %v2571_v38 = vand.u32 4294901760, %v988_v34  ;;  %v2574_v39 = vand.u32 4294901760, %v2559_v31 }
 0x549   :  { %v952_v41 = vpop.permute.xlu1 %951 }
 0x54a   :  { %v2580_v43 = vsub.f32 %v988_v34, %v2571_v38  ;;  %v962_v44 = vsel %vm722_vm3, %v952_v41, %v958_v19  ;;  %1974 = vmatprep.subr.mxu0 %v2571_v38  ;;  %v1151_v45 = vsub.f32 %v2559_v31, %v2574_v39 }
 0x54b   :  { %v968_v47 = vsel %vm964_vm0, %v962_v44, 0.0  ;;  %1975 = vmatpush3.msra.mxu0 %v2571_v38  ;;  %v1115_v44 = vand.u32 4294901760, %v1114_v16 }
 0x54c   :  { %v2594_v49 = vand.u32 4294901760, %v968_v47  ;;  %1976 = vmatprep.subr.mxu0 %v2540_v17  ;;  %v1152_v50 = vand.u32 4294901760, %v1151_v45  ;;  %v2599_v56 = vand.u32 4294901760, %v2580_v43 }
 0x54d   :  { %v950_v57 = vpop.permute.xlu1 %949  ;;  %1977 = vmatpush3.msra.mxu0 %v2540_v17 }
 0x54e   :  { %v2605_v58 = vsub.f32 %v968_v47, %v2594_v49  ;;  %v961_v60 = vsel %vm722_vm3, %v950_v57, %v956_v40  ;;  %1978 = vmatprep.subr.mxu0 %v2547_v23  ;;  %1995 = vmatprep.subr.mxu1 %v1152_v50  ;;  %v1158_v59 = vsub.f32 %v2580_v43, %v2599_v56 }
 0x54f   :  { %v967_v63 = vsel %vm964_vm0, %v961_v60, 0.0  ;;  %1979 = vmatpush3.msra.mxu0 %v2547_v23  ;;  %1996 = vmatpush3.msra.mxu1 %v1152_v50 }
 0x550   :  { %v2616_v8 = vand.u32 4294901760, %v967_v63  ;;  %1980 = vmatprep.subr.mxu0 %v2594_v49  ;;  %v1159_v2 = vand.u32 4294901760, %v1158_v59  ;;  %v2620_v4 = vand.u32 4294901760, %v2605_v58 }
 0x551   :  { %v931_v5 = vpop.permute.xlu1 %930  ;;  %1981 = vmatpush3.msra.mxu0 %v2594_v49 }
 0x552   :  { %v2624_v6 = vsub.f32 %v967_v63, %v2616_v8  ;;  %v942_v10 = vsel %vm940_vm1, %v931_v5, %v937_v62  ;;  %1982 = vmatprep.subr.mxu0 %v2616_v8  ;;  %1997 = vmatprep.subr.mxu1 %v1159_v2  ;;  %v1179_v12 = vsub.f32 %v2605_v58, %v2620_v4 }
 0x553   :  { %v948_v13 = vsel %vm944_vm4, %v942_v10, 0.0  ;;  %1983 = vmatpush3.msra.mxu0 %v2616_v8  ;;  %1998 = vmatpush3.msra.mxu1 %v1159_v2 }
 0x554   :  { %v2635_v18 = vand.u32 4294901760, %v948_v13  ;;  %1999 = vmatprep.subr.mxu1 %v1166_v11  ;;  %v2638_v19 = vand.u32 4294901760, %v2624_v6  ;;  %v1180_v29 = vand.u32 4294901760, %v1179_v12 }
 0x555   :  { %v929_v24 = vpop.permute.xlu1 %928  ;;  %2000 = vmatpush3.msra.mxu1 %v1166_v11 }
 0x556   :  { %v1191_v26 = vsub.f32 %v948_v13, %v2635_v18  ;;  %v941_v28 = vsel %vm940_vm1, %v929_v24, %v935_v22  ;;  %1984 = vmatprep.subr.mxu0 %v2635_v18  ;;  %2001 = vmatprep.subr.mxu1 %v1173_v54  ;;  %v1186_v32 = vsub.f32 %v2624_v6, %v2638_v19 }
 0x557   :  { %v947_v34 = vsel %vm944_vm4, %v941_v28, 0.0  ;;  %1985 = vmatpush3.msra.mxu0 %v2635_v18  ;;  %2002 = vmatpush3.msra.mxu1 %v1173_v54 }
 0x558   :  { %v2647_v40 = vand.u32 4294901760, %v947_v34  ;;  %2003 = vmatprep.subr.mxu1 %v1180_v29  ;;  %v1187_v41 = vand.u32 4294901760, %v1186_v32  ;;  %v2649_v45 = vand.u32 4294901760, %v1191_v26 }
 0x559   :  { %2004 = vmatpush3.msra.mxu1 %v1180_v29 }
 0x55a   :  { %v1198_v47 = vsub.f32 %v947_v34, %v2647_v40  ;;  %1986 = vmatprep.subr.mxu0 %v2647_v40  ;;  %2005 = vmatprep.subr.mxu1 %v1187_v41  ;;  %v1193_v50 = vsub.f32 %v1191_v26, %v2649_v45 }
 0x55b   :  { %1987 = vmatpush3.msra.mxu0 %v2647_v40  ;;  %2006 = vmatpush3.msra.mxu1 %v1187_v41  ;;  %v2188_v41 = vld [vmem:[#allocation7 + $0x8] sm:$0xff] }
 0x55c   :  { %2014 = vmatprep.subr.mxu0 %v2519_v7  ;;  %1989 = vmatmul.mubr.f32.vlgmr.msra.gmra.mxu0 %v1115_v44  ;;  %v1194_v51 = vand.u32 4294901760, %v1193_v50  ;;  %v2656_v57 = vand.u32 4294901760, %v1198_v47 }
 0x55d   :  { %2015 = vmatpush3.msra.mxu0 %v2519_v7  ;;  %2034 = vmatprep.mubr.f32.mxu0 %v2496_v52  ;;  %v2745_v52 = vpop.f32.mrf.mxu0 }
 0x55e   :  { %2007 = vmatprep.subr.mxu1 %v1194_v51  ;;  %2016 = vmatprep.subr.mxu0 %v2532_v55  ;;  %v1200_v20 = vsub.f32 %v1198_v47, %v2656_v57 }
 0x55f   :  { %2008 = vmatpush3.msra.mxu1 %v1194_v51  ;;  %2017 = vmatpush3.msra.mxu0 %v2532_v55 }
 0x560   :  { %2018 = vmatprep.subr.mxu0 %v2559_v31  ;;  %v1201_v60 = vand.u32 4294901760, %v1200_v20  ;;  %v2300_v20 = vmov 37  }
 0x561   :  { %2019 = vmatpush3.msra.mxu0 %v2559_v31 }
 0x562   :  { %2009 = vmatprep.subr.mxu1 %v1201_v60  ;;  %2020 = vmatprep.subr.mxu0 %v2580_v43 }
 0x563   :  { %2010 = vmatpush3.msra.mxu1 %v1201_v60  ;;  %2021 = vmatpush3.msra.mxu0 %v2580_v43 }
 0x564   :  { %2012 = vmatmul.mubr.f32.vlgmr.msra.gmra.mxu1 %v2563_v33  ;;  %2022 = vmatprep.subr.mxu0 %v2556_v30 }
 0x565   :  { %2037 = vmatprep.subr.mxu1 %v2516_v1  ;;  %2023 = vmatpush3.msra.mxu0 %v2556_v30 }
 0x566   :  { %2038 = vmatpush3.msra.mxu1 %v2516_v1  ;;  %2024 = vmatprep.subr.mxu0 %v2569_v35 }
 0x567   :  { %2039 = vmatprep.subr.mxu1 %v2528_v9  ;;  %2025 = vmatpush3.msra.mxu0 %v2569_v35 }
 0x568   :  { %2040 = vmatpush3.msra.mxu1 %v2528_v9  ;;  %2026 = vmatprep.subr.mxu0 %v2605_v58 }
 0x569   :  { %2041 = vmatprep.subr.mxu1 %v2551_v25  ;;  %2027 = vmatpush3.msra.mxu0 %v2605_v58 }
 0x56a   :  { %2042 = vmatpush3.msra.mxu1 %v2551_v25  ;;  %2028 = vmatprep.subr.mxu0 %v2624_v6 }
 0x56b   :  { %2043 = vmatprep.subr.mxu1 %v2571_v38  ;;  %2029 = vmatpush3.msra.mxu0 %v2624_v6 }
 0x56c   :  { %2044 = vmatpush3.msra.mxu1 %v2571_v38  ;;  %2030 = vmatprep.subr.mxu0 %v1191_v26 }
 0x56d   :  { %2045 = vmatprep.subr.mxu1 %v2540_v17  ;;  %2031 = vmatpush3.msra.mxu0 %v1191_v26 }
 0x56e   :  { %2046 = vmatpush3.msra.mxu1 %v2540_v17  ;;  %2032 = vmatprep.subr.mxu0 %v1198_v47 }
 0x56f   :  { %2047 = vmatprep.subr.mxu1 %v2547_v23  ;;  %2033 = vmatpush3.msra.mxu0 %v1198_v47 }
 0x570   :  { %2048 = vmatpush3.msra.mxu1 %v2547_v23  ;;  %2035 = vmatmul.mubr.f32.vlgmr.msra.gmra.mxu0 %v2587_v46 }
 0x571   :  { %2049 = vmatprep.subr.mxu1 %v2594_v49  ;;  %2060 = vmatprep.subr.mxu0 %v2524_v3 }
 0x572   :  { %2050 = vmatpush3.msra.mxu1 %v2594_v49  ;;  %2061 = vmatpush3.msra.mxu0 %v2524_v3  ;;  %v1013_v3 = vpop.permute.xlu1 %1012 }
 0x573   :  { %2051 = vmatprep.subr.mxu1 %v2616_v8  ;;  %2062 = vmatprep.subr.mxu0 %v2537_v14 }
 0x574   :  { %2052 = vmatpush3.msra.mxu1 %v2616_v8  ;;  %2063 = vmatpush3.msra.mxu0 %v2537_v14  ;;  %v1017_v14 = vpop.permute.xlu0 %1016 }
 0x575   :  { %2053 = vmatprep.subr.mxu1 %v2635_v18  ;;  %2064 = vmatprep.subr.mxu0 %v2574_v39 }
 0x576   :  { %2054 = vmatpush3.msra.mxu1 %v2635_v18  ;;  %2065 = vmatpush3.msra.mxu0 %v2574_v39 }
 0x577   :  { %2055 = vmatprep.subr.mxu1 %v2647_v40  ;;  %2066 = vmatprep.subr.mxu0 %v2599_v56 }
 0x578   :  { %2056 = vmatpush3.msra.mxu1 %v2647_v40  ;;  %2057 = vmatprep.mubr.f32.mxu1 %v1103_v53 }
 0x579   :  { %2067 = vmatpush3.msra.mxu0 %v2599_v56  ;;  %2058 = vmatmul.mubr.f32.vlgmr.msra.gmra.mxu1 %v1113_v61 }
 0x57a   :  { %2068 = vmatprep.subr.mxu0 %v2577_v42  ;;  %2083 = vmatprep.subr.mxu1 %v2516_v1 }
 0x57b   :  { %2069 = vmatpush3.msra.mxu0 %v2577_v42  ;;  %2084 = vmatpush3.msra.mxu1 %v2516_v1 }
 0x57c   :  { %2070 = vmatprep.subr.mxu0 %v2592_v48  ;;  %2085 = vmatprep.subr.mxu1 %v2528_v9 }
 0x57d   :  { %2071 = vmatpush3.msra.mxu0 %v2592_v48  ;;  %2086 = vmatpush3.msra.mxu1 %v2528_v9 }
 0x57e   :  { %2072 = vmatprep.subr.mxu0 %v2620_v4  ;;  %2087 = vmatprep.subr.mxu1 %v2551_v25 }
 0x57f   :  { %2073 = vmatpush3.msra.mxu0 %v2620_v4  ;;  %2088 = vmatpush3.msra.mxu1 %v2551_v25 }
 0x580   :  { %2074 = vmatprep.subr.mxu0 %v2638_v19  ;;  %2089 = vmatprep.subr.mxu1 %v2571_v38 }
 0x581   :  { %2075 = vmatpush3.msra.mxu0 %v2638_v19  ;;  %2090 = vmatpush3.msra.mxu1 %v2571_v38  ;;  %v2299_v19 = vmov 39  }
 0x582   :  { %2076 = vmatprep.subr.mxu0 %v2649_v45  ;;  %2091 = vmatprep.subr.mxu1 %v2540_v17 }
 0x583   :  { %2077 = vmatpush3.msra.mxu0 %v2649_v45  ;;  %2092 = vmatpush3.msra.mxu1 %v2540_v17 }
 0x584   :  { %2078 = vmatprep.subr.mxu0 %v2656_v57  ;;  %2093 = vmatprep.subr.mxu1 %v2547_v23 }
 0x585   :  { %2079 = vmatpush3.msra.mxu0 %v2656_v57  ;;  %2080 = vmatprep.mubr.f32.mxu0 %v2455_v21  ;;  %v2189_v57 = vld [vmem:[#allocation7] sm:$0xff] }
 0x586   :  { %2094 = vmatpush3.msra.mxu1 %v2547_v23  ;;  %2081 = vmatmul.mubr.f32.vlgmr.msra.gmra.mxu0 %v2563_v33 }
 0x587   :  { %2095 = vmatprep.subr.mxu1 %v2594_v49  ;;  %2103 = vmatprep.mubr.f32.mxu1 %v2455_v21  ;;  %v2747_v21 = vpop.f32.mrf.mxu1 }
 0x588   :  { %2096 = vmatpush3.msra.mxu1 %v2594_v49 }
 0x589   :  { %2097 = vmatprep.subr.mxu1 %v2616_v8 }
 0x58a   :  { %2098 = vmatpush3.msra.mxu1 %v2616_v8 }
 0x58b   :  { %2099 = vmatprep.subr.mxu1 %v2635_v18 }
 0x58c   :  { %2100 = vmatpush3.msra.mxu1 %v2635_v18 }
 0x58d   :  { %2101 = vmatprep.subr.mxu1 %v2647_v40 }
 0x58e   :  { %2102 = vmatpush3.msra.mxu1 %v2647_v40 }
 0x58f   :  { %2104 = vmatmul.mubr.f32.vlgmr.msra.gmra.mxu1 %v2563_v33 }
 0x61c   :  { %v1990_v53 = vpop.f32.mrf.mxu0 }
 0x61d   :  { %v1118_v31 = vadd.f32 %v1990_v53, %v1017_v14 }
 0x61e   :  { %v1107_v1 = vpop.f32.mrf.mxu0 }
 0x61f   :  { %v1108_v17 = vadd.f32 %v1107_v1, %v1013_v3 }
 0x624   :  { %v2013_v7 = vpop.f32.mrf.mxu1 }
 0x625   :  { %v1245_v42 = vadd.f32 %v2013_v7, %v1118_v31 }
 0x626   :  { %v1238_v55 = vpop.f32.mrf.mxu1 }
 0x627   :  { %v1239_v35 = vadd.f32 %v1238_v55, %v1108_v17  ;;  %v2301_v17 = vmov 36  }
 0x630   :  { %v2036_v9 = vpop.f32.mrf.mxu0 }
 0x631   :  { %v1344_v48 = vadd.f32 %v2036_v9, %v1245_v42 }
 0x632   :  { %v1336_v23 = vpop.f32.mrf.mxu0 }
 0x633   :  { %v1337_v39 = vadd.f32 %v1336_v23, %v1239_v35 }
 0x639   :  { %v2059_v25 = vpop.f32.mrf.mxu1 }
 0x63a   :  { %v1435_v58 = vadd.f32 %v2059_v25, %v1344_v48 }
 0x63b   :  { %v1426_v38 = vpop.f32.mrf.mxu1 }
 0x63c   :  { %v1427_v43 = vadd.f32 %v1426_v38, %v1337_v39 }
 0x646   :  { %v2082_v30 = vpop.f32.mrf.mxu0 }
 0x647   :  { %v1542_v61 = vadd.f32 %v2082_v30, %v1435_v58 }
 0x648   :  { %v1535_v33 = vpop.f32.mrf.mxu0 }
 0x649   :  { %v1536_v49 = vadd.f32 %v1535_v33, %v1427_v43 }
 0x64f   :  { %v2105_v46 = vpop.f32.mrf.mxu1 }
 0x650   :  { %v1629_v63 = vadd.f32 %v2105_v46, %v1542_v61 }
 0x651   :  { %v1622_v56 = vpop.f32.mrf.mxu1 }
 0x652   :  { %v1623_v59 = vadd.f32 %v1622_v56, %v1536_v49  ;;  %v1635_v0 = vsel %vm701_vm2, %v1629_v63, 0.0 }
 0x654   :  { %1640 = vrot.lane.b32.xlu1 %v1623_v59, %s2282_s0  ;;  %v1632_v62 = vsel %vm701_vm2, %v1623_v59, 0.0 }
 0x655   :  { %1633 = vadd.xlane.f32.xlu0 %v1632_v62 }
 0x658   :  { %1642 = vrot.lane.b32.xlu1 %v1629_v63, %s2282_s0 }
 0x67c   :  { %1636 = vadd.xlane.f32.xlu1 %v1635_v0 }
 0x6c6   :  { %v1641_v8 = vpop.permute.xlu1 %1640 }
 0x6c7   :  { %v1646_v2 = vsel %vm701_vm2, %v1641_v8, 0.0 }
 0x6c8   :  { %1647 = vadd.xlane.f32.xlu0 %v1646_v2 }
 0x6ca   :  { %v1643_v4 = vpop.permute.xlu1 %1642 }
 0x6cb   :  { %v1649_v5 = vsel %vm701_vm2, %v1643_v4, 0.0 }
 0x6cc   :  { %1650 = vadd.xlane.f32.xlu0 %v1649_v5 }
 0x6de   :  { %v1634_v6 = vpop.xlane.xlu0 %1633 }
 0x705   :  { %v1637_v11 = vpop.xlane.xlu1 %1636 }
 0x751   :  { %v1648_v10 = vpop.xlane.xlu0 %1647 }
 0x752   :  { %v1652_v13 = vsel %vm722_vm3, %v1634_v6, %v1648_v10 }
 0x755   :  { %v1651_v12 = vpop.xlane.xlu0 %1650 }
 0x756   :  { %v1653_v16 = vsel %vm722_vm3, %v1637_v11, %v1651_v12 }
 0x757   :  { %v1654_v18 = vadd.f32 %v1653_v16, %v1652_v13 }
 0x759   :  { %v1655_v54 = vmul.f32 0.03125, %v1654_v18 }
 0x75b   :  { %1662 = vperm.xlu0 %2146, %v1655_v54   ;;  %1658 = vperm.xlu1 %2145, %v1655_v54  }
 0x75f   :  { %2148 = vset.pattern.permute.xlu0 %v2299_v19  ;;  %2147 = vset.pattern.permute.xlu1 %v2299_v19 }
 0x7d6   :  { %v1663_v22 = vpop.permute.xlu0 %1662  ;;  %v1659_v24 = vpop.permute.xlu1 %1658 }
 0x7d7   :  { %v1665_v26 = vsel %vm701_vm2, %v1659_v24, %v1663_v22 }
 0x7d8   :  { %v1666_v28 = vsub.f32 %v1623_v59, %v1665_v26  ;;  %v1667_v29 = vsub.f32 %v1629_v63, %v1665_v26 }
 0x7da   :  { %v1668_v32 = vmul.f32 %v1666_v28, %v1666_v28  ;;  %v1669_v34 = vmul.f32 %v1667_v29, %v1667_v29 }
 0x7dc   :  { %1678 = vrot.lane.b32.xlu1 %v1668_v32, %s2282_s0  ;;  %v1673_v40 = vsel %vm701_vm2, %v1669_v34, 0.0  ;;  %v1670_v44 = vsel %vm701_vm2, %v1668_v32, 0.0  ;;  %v580_v32 = vadd.f32 %v2745_v52, %v2421_v15 }
 0x7dd   :  { %1674 = vadd.xlane.f32.xlu0 %v1673_v40 }
 0x7e0   :  { %1680 = vrot.lane.b32.xlu1 %v1669_v34, %s2282_s0  ;;  %v672_v34 = vadd.f32 %v2747_v21, %v580_v32 }
 0x7f3   :  { %696 = vperm.xlu0 %2148, %v2188_v41  }
 0x7f7   :  { %2153 = vset.pattern.permute.xlu0 %v2300_v20 }
 0x804   :  { %1671 = vadd.xlane.f32.xlu1 %v1670_v44 }
 0x84e   :  { %v1679_v45 = vpop.permute.xlu1 %1678 }
 0x84f   :  { %v1684_v47 = vsel %vm701_vm2, %v1679_v45, 0.0 }
 0x850   :  { %1685 = vadd.xlane.f32.xlu1 %v1684_v47 }
 0x852   :  { %v1681_v50 = vpop.permute.xlu1 %1680 }
 0x853   :  { %v1687_v51 = vsel %vm701_vm2, %v1681_v50, 0.0 }
 0x854   :  { %1688 = vadd.xlane.f32.xlu1 %v1687_v51 }
 0x865   :  { %692 = vperm.xlu1 %2147, %v2189_v57  }
 0x866   :  { %v1675_v1 = vpop.xlane.xlu0 %1674 }
 0x869   :  { %2149 = vset.pattern.permute.xlu1 %v2283_v36 }
 0x86e   :  { %v697_v40 = vpop.permute.xlu0 %696 }
 0x86f   :  { %v700_v50 = vadd.f32 %v697_v40, %v2423_v27 }
 0x88d   :  { %v1672_v60 = vpop.xlane.xlu1 %1671 }
 0x8d9   :  { %v1686_v53 = vpop.xlane.xlu1 %1685 }
 0x8da   :  { %v1690_v3 = vsel %vm722_vm3, %v1672_v60, %v1686_v53 }
 0x8dd   :  { %v1689_v7 = vpop.xlane.xlu1 %1688 }
 0x8de   :  { %v1691_v9 = vsel %vm722_vm3, %v1675_v1, %v1689_v7 }
 0x8df   :  { %v1692_v55 = vadd.f32 %v1691_v9, %v1690_v3 }
 0x8e1   :  { %v1693_v14 = vmul.f32 0.03125, %v1692_v55  ;;  %v693_v36 = vpop.permute.xlu1 %692 }
 0x8e2   :  { %v699_v45 = vadd.f32 %v693_v36, %v672_v34 }
 0x8e3   :  { %1696 = vperm.xlu1 %2149, %v1693_v14  }
 0x8e7   :  { %2150 = vset.pattern.permute.xlu1 %v2284_v37 }
 0x8e8   :  { %1700 = vperm.xlu1 %2150, %v1693_v14  }
 0x8ec   :  { %2151 = vset.pattern.permute.xlu1 %v2301_v17 }
 0x8ed   :  { %1709 = vperm.xlu1 %2151, %v2189_v57  }
 0x8f1   :  { %1713 = vperm.xlu1 %2151, %v2188_v41  }
 0x8f5   :  { %2152 = vset.pattern.permute.xlu1 %v2300_v20 }
 0x8f6   :  { %1719 = vperm.xlu1 %2152, %v2189_v57  }
 0x8fa   :  { %1723 = vperm.xlu1 %2152, %v2188_v41  }
 0x95e   :  { %v1697_v23 = vpop.permute.xlu1 %1696 }
 0x963   :  { %v1701_v25 = vpop.permute.xlu1 %1700 }
 0x964   :  { %v1703_v30 = vsel %vm701_vm2, %v1697_v23, %v1701_v25 }
 0x965   :  { %v1704_v31 = vadd.f32 1e-05, %v1703_v30 }
 0x967   :  { %2174 = vrsqrt.f32 %v1704_v31 }
 0x968   :  { %v1710_v35 = vpop.permute.xlu1 %1709 }
 0x96c   :  { %v1714_v38 = vpop.permute.xlu1 %1713 }
 0x971   :  { %v1720_v39 = vpop.permute.xlu1 %1719 }
 0x974   :  { %v2175_v33 = vpop.eup %2174 }
 0x975   :  { %v1706_v37 = vmul.f32 %v2175_v33, %v1666_v28  ;;  %v1707_v42 = vmul.f32 %v2175_v33, %v1667_v29  ;;  %v1724_v48 = vpop.permute.xlu1 %1723 }
 0x977   :  { %v1716_v43 = vmul.f32 %v1710_v35, %v1706_v37  ;;  %v1717_v46 = vmul.f32 %v1714_v38, %v1707_v42 }
 0x979   :  { %v1726_v49 = vadd.f32 %v1720_v39, %v1716_v43  ;;  %v1727_v56 = vadd.f32 %v1724_v48, %v1717_v46 }
 0x97b   :  { %v1730_v58 = vmin.f32 %v1726_v49, 20.0  ;;  %v1731_v59 = vmin.f32 %v1727_v56, 20.0  ;;  %vm1728_vm3 = vcmp.gt.f32.partialorder %v1726_v49, 20.0  ;;  %vm1729_vm6 = vcmp.gt.f32.partialorder %v1727_v56, 20.0 }
 0x97d   :  { %v1732_v61 = vmul.f32 1.442695, %v1730_v58  ;;  %v1734_v62 = vmul.f32 1.442695, %v1731_v59 }
 0x97f   :  { %2176 = vpow2.f32 %v1732_v61 }
 0x980   :  { %2178 = vpow2.f32 %v1734_v62 }
 0x98c   :  { %v2177_v63 = vpop.eup %2176 }
 0x98d   :  { %v2179_v0 = vpop.eup %2178  ;;  %v1736_v8 = vadd.f32 1.0, %v2177_v63  ;;  %v1739_v4 = vmul.f32 -0.5, %v2177_v63  ;;  %v1742_v10 = vand.u32 2147483647, %v2177_v63 }
 0x98e   :  { %v1745_v2 = vadd.f32 1.0, %v2179_v0  ;;  %v1748_v5 = vmul.f32 -0.5, %v2179_v0  ;;  %v1751_v12 = vand.u32 2147483647, %v2179_v0 }
 0x98f   :  { %2180 = vlog2.f32 %v1736_v8  ;;  %v1740_v6 = vadd.f32 1.0, %v1739_v4  ;;  %vm1743_vm2 = vcmp.lt.f32.partialorder %v1742_v10, 0.0004427343 }
 0x990   :  { %2182 = vlog2.f32 %v1745_v2  ;;  %v1749_v11 = vadd.f32 1.0, %v1748_v5  ;;  %vm1752_vm5 = vcmp.lt.f32.partialorder %v1751_v12, 0.0004427343 }
 0x991   :  { %v1741_v54 = vmul.f32 %v2177_v63, %v1740_v6 }
 0x992   :  { %v1750_v22 = vmul.f32 %v2179_v0, %v1749_v11 }
 0x99c   :  { %v2181_v13 = vpop.eup %2180 }
 0x99d   :  { %v2183_v16 = vpop.eup %2182  ;;  %v1738_v18 = vmul.f32 0.6931472, %v2181_v13 }
 0x99e   :  { %v1747_v19 = vmul.f32 0.6931472, %v2183_v16 }
 0x99f   :  { %v1744_v24 = vsel %vm1743_vm2, %v1741_v54, %v1738_v18 }
 0x9a0   :  { %v1754_v26 = vsel %vm1728_vm3, %v1726_v49, %v1744_v24  ;;  %v1753_v28 = vsel %vm1752_vm5, %v1750_v22, %v1747_v19 }
 0x9a1   :  { %2184 = vtanh.f32 %v1754_v26  ;;  %v1755_v29 = vsel %vm1729_vm6, %v1727_v56, %v1753_v28 }
 0x9a2   :  { %2186 = vtanh.f32 %v1755_v29 }
 0x9ae   :  { %v2185_v41 = vpop.eup %2184 }
 0x9af   :  { %v2187_v44 = vpop.eup %2186  ;;  %v1758_v47 = vmul.f32 %v2185_v41, %v1726_v49 }
 0x9b0   :  { %v1759_v51 = vmul.f32 %v2187_v44, %v1727_v56 }
 0x9b1   :  { %v1760_v57 = vadd.f32 %v1758_v47, %v699_v45 }
 0x9b2   :  { %v1761_v20 = vadd.f32 %v1759_v51, %v700_v50 }
 0x9b3   :  { %1762 = vst.msk [vmem:[#allocation8] sm:$0xff] %vm867_vm7, %v1760_v57 }
 0x9b4   :  { %1763 = vst.msk [vmem:[#allocation8 + $0x8] sm:$0xff] %vm867_vm7, %v1761_v20 }
 0x9b5   :  { %2261 = shalt.err (!%p2258_p5)
}
 0x9b6   :  { %1775 = dma.vmem_to_hbm [thread:$0]  %s1770_s11, 256, %s2784_s3, [#allocation4], %s2278_s20, %s2278_s20, %s2279_s21  }
 0x9b7   :  { %2274 = dma.done.wait [#allocation4], 256  }
 0x9b8   :  { %2275 = vsyncadd [#allocation4], 4294967040 }
 0x9b9   :  { %1779 = vsyncpa [#allocation3], 1 }
 0x9ba   :  { %1780 = vsyncpa [#allocation6], 1 }
 0x9bb   :  { %1781 = vsyncpa [#allocation4], 1 }

</bundles_post_ra>
